<compile_context>
chip_gen: v5e
topology: v5e:2x2
jax: 0.10.0
libtpu: 0.0.40
codegen_flags: <defaults>
</compile_context>

<pallas_src>
import functools
import math

import jax
import jax.numpy as jnp
from jax import lax
from jax.experimental import pallas as pl
from jax.experimental.pallas import tpu as pltpu


def _bigru_last_kernel(x_ref, wih_cat_ref, bi_cat_ref, whh_ref, bhn_f_ref,
                       bhn_b_ref, out_ref, gi_ref, *, fuse_hidden, unroll):
    # x_ref:       (T, B_tile, D)       time-major block (compute dtype)
    # wih_cat_ref: (D, 6H)              [W_ih_fwd | W_ih_bwd], gate order [r,z,n]
    # bi_cat_ref:  (1, 6H)  f32         fused input biases (b_ih + b_hh for r/z, b_in for n)
    # whh_ref:     (2H, 6H) block-diag  if fuse_hidden else (2, H, 3H) stacked
    # bhn_*_ref:   (1, H)   f32         b_hn (sits under r * (...) in the n gate)
    # out_ref:     (B_tile, 2H) f32     [:, :H] = fwd final hidden, [:, H:] = bwd final
    # gi_ref:      (T, B_tile, 6H)      VMEM scratch for the hoisted input projection
    T, Bt, D = x_ref.shape
    H6 = gi_ref.shape[-1]
    H = H6 // 6
    H2, H3 = 2 * H, 3 * H

    wih_cat = wih_cat_ref[...]
    bi_cat = bi_cat_ref[...]
    wdtype = wih_cat.dtype

    # ---- Phase 1: hoisted input projection for BOTH directions, as ONE big matmul
    # (M = T*Bt). Off the serial chain; bias added once to the whole slab.
    x_all = x_ref[...].reshape(T * Bt, D)
    gi_all = jnp.dot(x_all, wih_cat, preferred_element_type=jnp.float32) + bi_cat
    gi_ref[...] = gi_all.astype(gi_ref.dtype).reshape(T, Bt, H6)

    # Hoisted bias broadcasts (JAX does not CSE broadcast_in_dim -> do them once).
    bhn_f = jnp.broadcast_to(bhn_f_ref[...], (Bt, H)).astype(jnp.float32)
    bhn_b = jnp.broadcast_to(bhn_b_ref[...], (Bt, H)).astype(jnp.float32)

    def gru_gate(h, gi, gh, bhn):
        # PyTorch GRU cell (gate order [r, z, n]); gi already holds b_ih (+ b_hh
        # for the r/z gates). Only b_hn is added here (under r * (...)).
        rz = jax.nn.sigmoid(gi[:, :H2] + gh[:, :H2])       # one wide EUP push
        r = rz[:, :H]
        z = rz[:, H:]
        n = jnp.tanh(gi[:, H2:] + r * (gh[:, H2:] + bhn))
        return n + z * (h - n)                              # == (1-z)*n + z*h

    # ---- Phase 2: fused forward + backward serial recurrence.
    if fuse_hidden:
        whh_bd = whh_ref[...]            # (2H, 6H) block-diagonal

        def body(t, carry):
            h_f, h_b = carry
            h_cat = jnp.concatenate([h_f, h_b], axis=-1).astype(wdtype)
            gh = jnp.dot(h_cat, whh_bd, preferred_element_type=jnp.float32)
            gi_f = gi_ref[t][:, :H3].astype(jnp.float32)
            gi_b = gi_ref[T - 1 - t][:, H3:].astype(jnp.float32)
            h_f = gru_gate(h_f, gi_f, gh[:, :H3], bhn_f)
            h_b = gru_gate(h_b, gi_b, gh[:, H3:], bhn_b)
            return (h_f, h_b)
    else:
        whh_f = whh_ref[0]               # (H, 3H), hoisted loads
        whh_b = whh_ref[1]

        def body(t, carry):
            h_f, h_b = carry
            gh_f = jnp.dot(h_f.astype(wdtype), whh_f,
                           preferred_element_type=jnp.float32)
            gh_b = jnp.dot(h_b.astype(wdtype), whh_b,
                           preferred_element_type=jnp.float32)
            gi_f = gi_ref[t][:, :H3].astype(jnp.float32)
            gi_b = gi_ref[T - 1 - t][:, H3:].astype(jnp.float32)
            h_f = gru_gate(h_f, gi_f, gh_f, bhn_f)
            h_b = gru_gate(h_b, gi_b, gh_b, bhn_b)
            return (h_f, h_b)

    h0 = jnp.zeros((Bt, H), jnp.float32)
    h_f, h_b = lax.fori_loop(0, T, body, (h0, h0), unroll=unroll)

    # Single lane-dense store of [fwd final | bwd final].
    out_ref[...] = jnp.concatenate([h_f, h_b], axis=-1).astype(out_ref.dtype)


def question_embedding_forward(x, params, *, compute_dtype=jnp.float32,
                               gi_dtype=jnp.float32, batch_tile=128):
    """x: (B, T, D) batch-first, like the PyTorch module. Returns (B, 2*H) f32."""
    B, T, D = x.shape
    H = params["whh_f"].shape[0]
    H2, H3, H6 = 2 * H, 3 * H, 6 * H

    # Fold b_ih + b_hh for the r/z gates into the hoisted input-projection bias;
    # b_hn stays separate (it sits under the r * (...) term in the n gate).
    def fused_bias(bih, bhh):
        return jnp.concatenate([bih[:, :H2] + bhh[:, :H2], bih[:, H2:]], axis=1)

    wih_cat = jnp.concatenate([params["wih_f"], params["wih_b"]],
                              axis=1).astype(compute_dtype)           # (D, 6H)
    bi_cat = jnp.concatenate([fused_bias(params["bih_f"], params["bhh_f"]),
                              fused_bias(params["bih_b"], params["bhh_b"])],
                             axis=1).astype(jnp.float32)              # (1, 6H)
    bhn_f = params["bhh_f"][:, H2:].astype(jnp.float32)               # (1, H)
    bhn_b = params["bhh_b"][:, H2:].astype(jnp.float32)

    whh_f = params["whh_f"].astype(compute_dtype)                     # (H, 3H)
    whh_b = params["whh_b"].astype(compute_dtype)
    fuse_hidden = H <= 128
    if fuse_hidden:
        # Block-diagonal (2H, 6H): one serial-path matmul per step instead of two.
        zpad = jnp.zeros((H, H3), compute_dtype)
        whh = jnp.concatenate(
            [jnp.concatenate([whh_f, zpad], axis=1),
             jnp.concatenate([zpad, whh_b], axis=1)], axis=0)
    else:
        whh = jnp.stack([whh_f, whh_b], axis=0)                       # (2, H, 3H)

    # Time-major x: each timestep becomes a contiguous (b_tile, D) MXU-LHS slab.
    x = jnp.transpose(x, (1, 0, 2)).astype(compute_dtype)             # (T, B, D)

    # Batch tiling: "parallel" grid axis -> pipelined x DMA + multi-core sharding.
    # (On v7x choose batch_tile so that n_tiles >= 2 to occupy both TensorCores.)
    b_tile = min(B, batch_tile)
    n_tiles = pl.cdiv(B, b_tile)
    B_pad = n_tiles * b_tile
    if B_pad != B:
        x = jnp.pad(x, ((0, 0), (0, B_pad - B), (0, 0)))

    # Full unroll only for short sequences; cap for long T to bound code size.
    unroll = True if T <= 32 else 8

    # Explicit VMEM budget: gi scratch + double-buffered x blocks + resident
    # weights + double-buffered out block, plus headroom.
    cbytes = jnp.dtype(compute_dtype).itemsize
    gi_bytes = T * b_tile * H6 * jnp.dtype(gi_dtype).itemsize
    x_bytes = 2 * T * b_tile * D * cbytes
    w_bytes = (D * H6 + int(whh.size)) * cbytes + (H6 + 2 * H) * 4
    out_bytes = 2 * b_tile * H2 * 4
    budget = int(1.3 * (gi_bytes + x_bytes + w_bytes + out_bytes)) + (4 << 20)
    vmem_limit = max(32 << 20, min(budget, 128 << 20))

    # Weights: full-array VMEM specs (fetched once, stay resident across grid steps).
    full = pl.BlockSpec(memory_space=pltpu.MemorySpace.VMEM)

    kernel = functools.partial(_bigru_last_kernel, fuse_hidden=fuse_hidden,
                               unroll=unroll)

    out = pl.pallas_call(
        kernel,
        out_shape=jax.ShapeDtypeStruct((B_pad, H2), jnp.float32),
        grid=(n_tiles,),
        in_specs=[
            pl.BlockSpec((T, b_tile, D), lambda i: (0, i, 0)),  # x (time-major)
            full,  # wih_cat
            full,  # bi_cat
            full,  # whh (block-diag or stacked)
            full,  # bhn_f
            full,  # bhn_b
        ],
        out_specs=pl.BlockSpec((b_tile, H2), lambda i: (i, 0)),
        scratch_shapes=[pltpu.VMEM((T, b_tile, H6), gi_dtype)],
        compiler_params=pltpu.CompilerParams(
            dimension_semantics=("parallel",),
            vmem_limit_bytes=vmem_limit),
    )(x, wih_cat, bi_cat, whh, bhn_f, bhn_b)
    return out[:B]


def init_params(key, in_dim, num_hid):
    """PyTorch-style GRU init: uniform(-1/sqrt(H), 1/sqrt(H)).

    Weights stored pre-transposed for the kernel: W_ih -> (D, 3H), W_hh -> (H, 3H).
    Gate order along 3H is PyTorch's [r, z, n].
    """
    H = num_hid // 2  # per-direction hidden (bidirect=True halves num_hid)
    k = 1.0 / math.sqrt(H)
    keys = jax.random.split(key, 8)

    def u(kk, shape):
        return jax.random.uniform(kk, shape, jnp.float32, -k, k)

    return {
        "wih_f": u(keys[0], (in_dim, 3 * H)),
        "whh_f": u(keys[1], (H, 3 * H)),
        "bih_f": u(keys[2], (1, 3 * H)),
        "bhh_f": u(keys[3], (1, 3 * H)),
        "wih_b": u(keys[4], (in_dim, 3 * H)),
        "whh_b": u(keys[5], (H, 3 * H)),
        "bih_b": u(keys[6], (1, 3 * H)),
        "bhh_b": u(keys[7], (1, 3 * H)),
    }


def _reference_forward(x, params):
    """Pure-JAX reference (lax.scan GRU, unfused biases) for correctness checking."""
    H = params["whh_f"].shape[0]

    def cell(h, x_t, wih, whh, bih, bhh):
        gi = x_t @ wih + bih
        gh = h @ whh + bhh
        r = jax.nn.sigmoid(gi[:, :H] + gh[:, :H])
        z = jax.nn.sigmoid(gi[:, H:2 * H] + gh[:, H:2 * H])
        n = jnp.tanh(gi[:, 2 * H:] + r * gh[:, 2 * H:])
        return (1.0 - z) * n + z * h

    B, T, D = x.shape
    x_tm = jnp.transpose(x, (1, 0, 2))
    h0 = jnp.zeros((B, H), jnp.float32)

    def scan_dir(xs, wih, whh, bih, bhh):
        def body(h, x_t):
            h = cell(h, x_t, wih, whh, bih, bhh)
            return h, None
        h_last, _ = lax.scan(body, h0, xs)
        return h_last

    h_f = scan_dir(x_tm, params["wih_f"], params["whh_f"],
                   params["bih_f"], params["bhh_f"])
    h_b = scan_dir(x_tm[::-1], params["wih_b"], params["whh_b"],
                   params["bih_b"], params["bhh_b"])
    return jnp.concatenate([h_f, h_b], axis=1)


if __name__ == "__main__":
    # --- main small test (fused block-diag hidden matmul path, H=16) ---
    B, T, D, NUM_HID = 2, 8, 32, 32  # -> per-direction H = 16, output (B, 32)

    key = jax.random.PRNGKey(0)
    k_x, k_p = jax.random.split(key)
    x = jax.random.normal(k_x, (B, T, D), dtype=jnp.float32)
    params = init_params(k_p, D, NUM_HID)

    out = jax.block_until_ready(question_embedding_forward(x, params))
    ref = jax.block_until_ready(_reference_forward(x, params))
    assert out.shape == (B, NUM_HID), out.shape
    assert jnp.allclose(out, ref, atol=1e-5, rtol=1e-5), \
        float(jnp.max(jnp.abs(out - ref)))

    # bf16 matmul fast path + bf16 gi scratch (v7x VMEM relief); state/gates f32.
    out_bf16 = jax.block_until_ready(
        question_embedding_forward(x, params, compute_dtype=jnp.bfloat16,
                                   gi_dtype=jnp.bfloat16))
    assert out_bf16.shape == (B, NUM_HID)
    assert float(jnp.max(jnp.abs(out_bf16 - ref))) < 5e-2, \
        float(jnp.max(jnp.abs(out_bf16 - ref)))

    # --- second test: unfused (large-H) path, multi-tile grid + batch padding ---
    B2, T2, D2, NUM_HID2 = 10, 8, 64, 512  # -> H = 256 (> 128), b_tile=8, 2 tiles
    k_x2, k_p2 = jax.random.split(jax.random.PRNGKey(1))
    x2 = jax.random.normal(k_x2, (B2, T2, D2), dtype=jnp.float32)
    params2 = init_params(k_p2, D2, NUM_HID2)
    out2 = jax.block_until_ready(
        question_embedding_forward(x2, params2, batch_tile=8))
    ref2 = jax.block_until_ready(_reference_forward(x2, params2))
    assert out2.shape == (B2, NUM_HID2), out2.shape
    assert jnp.allclose(out2, ref2, atol=1e-4, rtol=1e-4), \
        float(jnp.max(jnp.abs(out2 - ref2)))

    print("KERNEL_OK")
</pallas_src>

<mosaic_0001>
module attributes {stable_mosaic.version = 11 : i64} {
  func.func @_bigru_last_kernel(%arg0: i32, %arg1: memref<8x2x32xf32, #tpu.memory_space<vmem>>, %arg2: memref<32x96xf32, #tpu.memory_space<vmem>>, %arg3: memref<1x96xf32, #tpu.memory_space<vmem>>, %arg4: memref<32x96xf32, #tpu.memory_space<vmem>>, %arg5: memref<1x16xf32, #tpu.memory_space<vmem>>, %arg6: memref<1x16xf32, #tpu.memory_space<vmem>>, %arg7: memref<2x32xf32, #tpu.memory_space<vmem>>, %arg8: memref<8x2x96xf32, #tpu.memory_space<vmem>>) attributes {dimension_semantics = [#tpu.dimension_semantics<parallel>], iteration_bounds = array<i64: 1>, scalar_prefetch = 0 : i64, scratch_operands = 1 : i64, tpu.core_type = #tpu.core_type<tc>, window_params = [{transform_indices = @transform_0, window_bounds = array<i64: 8, 2, 32>}, {pipeline_mode = #tpu.pipeline_mode<synchronous>, transform_indices = @transform_1, window_bounds = array<i64: 32, 96>}, {pipeline_mode = #tpu.pipeline_mode<synchronous>, transform_indices = @transform_2, window_bounds = array<i64: 1, 96>}, {pipeline_mode = #tpu.pipeline_mode<synchronous>, transform_indices = @transform_3, window_bounds = array<i64: 32, 96>}, {pipeline_mode = #tpu.pipeline_mode<synchronous>, transform_indices = @transform_4, window_bounds = array<i64: 1, 16>}, {pipeline_mode = #tpu.pipeline_mode<synchronous>, transform_indices = @transform_5, window_bounds = array<i64: 1, 16>}, {transform_indices = @transform_6, window_bounds = array<i64: 2, 32>}]} {
    %c0 = arith.constant 0 : index
    %c0_0 = arith.constant 0 : index
    %0 = vector.load %arg2[%c0, %c0_0] : memref<32x96xf32, #tpu.memory_space<vmem>>, vector<32x96xf32>
    %c0_1 = arith.constant 0 : index
    %c0_2 = arith.constant 0 : index
    %1 = vector.load %arg3[%c0_1, %c0_2] : memref<1x96xf32, #tpu.memory_space<vmem>>, vector<1x96xf32>
    %c0_3 = arith.constant 0 : index
    %c0_4 = arith.constant 0 : index
    %c0_5 = arith.constant 0 : index
    %2 = vector.load %arg1[%c0_3, %c0_4, %c0_5] : memref<8x2x32xf32, #tpu.memory_space<vmem>>, vector<8x2x32xf32>
    %3 = vector.shape_cast %2 : vector<8x2x32xf32> to vector<16x32xf32>
    %cst = arith.constant dense<0.000000e+00> : vector<16x96xf32>
    %4 = tpu.matmul %3, %0, %cst {dimension_numbers = #tpu.dot_dimension_numbers<[1], [0], [0], [1], [0, 0, 1, 1], [], []>} : vector<16x32xf32>, vector<32x96xf32>, vector<16x96xf32> -> vector<16x96xf32>
    %5 = vector.broadcast %1 : vector<1x96xf32> to vector<16x96xf32>
    %6 = arith.addf %4, %5 : vector<16x96xf32>
    %7 = vector.shape_cast %6 : vector<16x96xf32> to vector<8x2x96xf32>
    %c0_6 = arith.constant 0 : index
    %c0_7 = arith.constant 0 : index
    %c0_8 = arith.constant 0 : index
    %8 = vector.load %arg8[%c0_6, %c0_7, %c0_8] : memref<8x2x96xf32, #tpu.memory_space<vmem>>, vector<8x2x96xf32>
    tpu.vector_store %arg8[%c0_6, %c0_7, %c0_8], %7 {strides = array<i32>} : memref<8x2x96xf32, #tpu.memory_space<vmem>>, vector<8x2x96xf32>,
    %c0_9 = arith.constant 0 : index
    %c0_10 = arith.constant 0 : index
    %9 = vector.load %arg5[%c0_9, %c0_10] : memref<1x16xf32, #tpu.memory_space<vmem>>, vector<1x16xf32>
    %10 = vector.shape_cast %9 : vector<1x16xf32> to vector<1x16xf32>
    %11 = vector.broadcast %10 : vector<1x16xf32> to vector<2x16xf32>
    %c0_11 = arith.constant 0 : index
    %c0_12 = arith.constant 0 : index
    %12 = vector.load %arg6[%c0_11, %c0_12] : memref<1x16xf32, #tpu.memory_space<vmem>>, vector<1x16xf32>
    %13 = vector.shape_cast %12 : vector<1x16xf32> to vector<1x16xf32>
    %14 = vector.broadcast %13 : vector<1x16xf32> to vector<2x16xf32>
    %c0_13 = arith.constant 0 : index
    %c0_14 = arith.constant 0 : index
    %15 = vector.load %arg4[%c0_13, %c0_14] : memref<32x96xf32, #tpu.memory_space<vmem>>, vector<32x96xf32>
    %cst_15 = arith.constant 0.000000e+00 : f32
    %16 = vector.broadcast %cst_15 : f32 to vector<2x16xf32>
    %c0_i32 = arith.constant 0 : i32
    %17 = tpu.concatenate %16, %16 in 1 : vector<2x16xf32>, vector<2x16xf32> -> vector<2x32xf32>
    %cst_16 = arith.constant dense<0.000000e+00> : vector<2x96xf32>
    %18 = tpu.matmul %17, %15, %cst_16 {dimension_numbers = #tpu.dot_dimension_numbers<[1], [0], [0], [1], [0, 0, 1, 1], [], []>} : vector<2x32xf32>, vector<32x96xf32>, vector<2x96xf32> -> vector<2x96xf32>
    %19 = arith.index_cast %c0_i32 : i32 to index
    %c0_17 = arith.constant 0 : index
    %c0_18 = arith.constant 0 : index
    %20 = vector.load %arg8[%19, %c0_17, %c0_18] : memref<8x2x96xf32, #tpu.memory_space<vmem>>, vector<1x2x96xf32>
    %21 = vector.shape_cast %20 : vector<1x2x96xf32> to vector<2x96xf32>
    %22 = vector.extract_strided_slice %21 {offsets = [0, 0], sizes = [2, 48], strides = [1, 1]} : vector<2x96xf32> to vector<2x48xf32>
    %c7_i32 = arith.constant 7 : i32
    %23 = arith.subi %c7_i32, %c0_i32 : i32
    %24 = arith.index_cast %23 : i32 to index
    %c0_19 = arith.constant 0 : index
    %c0_20 = arith.constant 0 : index
    %25 = vector.load %arg8[%24, %c0_19, %c0_20] : memref<8x2x96xf32, #tpu.memory_space<vmem>>, vector<1x2x96xf32>
    %26 = vector.shape_cast %25 : vector<1x2x96xf32> to vector<2x96xf32>
    %27 = vector.extract_strided_slice %26 {offsets = [0, 48], sizes = [2, 48], strides = [1, 1]} : vector<2x96xf32> to vector<2x48xf32>
    %28 = vector.extract_strided_slice %18 {offsets = [0, 0], sizes = [2, 48], strides = [1, 1]} : vector<2x96xf32> to vector<2x48xf32>
    %29 = vector.extract_strided_slice %22 {offsets = [0, 0], sizes = [2, 32], strides = [1, 1]} : vector<2x48xf32> to vector<2x32xf32>
    %30 = vector.extract_strided_slice %28 {offsets = [0, 0], sizes = [2, 32], strides = [1, 1]} : vector<2x48xf32> to vector<2x32xf32>
    %31 = arith.addf %29, %30 : vector<2x32xf32>
    %32 = arith.negf %31 : vector<2x32xf32>
    %33 = math.exp %32 : vector<2x32xf32>
    %cst_21 = arith.constant 1.000000e+00 : f32
    %34 = vector.broadcast %cst_21 : f32 to vector<2x32xf32>
    %35 = arith.addf %34, %33 : vector<2x32xf32>
    %36 = arith.divf %34, %35 : vector<2x32xf32>
    %37 = vector.extract_strided_slice %36 {offsets = [0, 0], sizes = [2, 16], strides = [1, 1]} : vector<2x32xf32> to vector<2x16xf32>
    %38 = vector.extract_strided_slice %36 {offsets = [0, 16], sizes = [2, 16], strides = [1, 1]} : vector<2x32xf32> to vector<2x16xf32>
    %39 = vector.extract_strided_slice %22 {offsets = [0, 32], sizes = [2, 16], strides = [1, 1]} : vector<2x48xf32> to vector<2x16xf32>
    %40 = vector.extract_strided_slice %28 {offsets = [0, 32], sizes = [2, 16], strides = [1, 1]} : vector<2x48xf32> to vector<2x16xf32>
    %41 = arith.addf %40, %11 : vector<2x16xf32>
    %42 = arith.mulf %37, %41 : vector<2x16xf32>
    %43 = arith.addf %39, %42 : vector<2x16xf32>
    %44 = math.tanh %43 : vector<2x16xf32>
    %45 = arith.subf %16, %44 : vector<2x16xf32>
    %46 = arith.mulf %38, %45 : vector<2x16xf32>
    %47 = arith.addf %44, %46 : vector<2x16xf32>
    %48 = vector.extract_strided_slice %18 {offsets = [0, 48], sizes = [2, 48], strides = [1, 1]} : vector<2x96xf32> to vector<2x48xf32>
    %49 = vector.extract_strided_slice %27 {offsets = [0, 0], sizes = [2, 32], strides = [1, 1]} : vector<2x48xf32> to vector<2x32xf32>
    %50 = vector.extract_strided_slice %48 {offsets = [0, 0], sizes = [2, 32], strides = [1, 1]} : vector<2x48xf32> to vector<2x32xf32>
    %51 = arith.addf %49, %50 : vector<2x32xf32>
    %52 = arith.negf %51 : vector<2x32xf32>
    %53 = math.exp %52 : vector<2x32xf32>
    %cst_22 = arith.constant 1.000000e+00 : f32
    %54 = vector.broadcast %cst_22 : f32 to vector<2x32xf32>
    %55 = arith.addf %54, %53 : vector<2x32xf32>
    %56 = arith.divf %54, %55 : vector<2x32xf32>
    %57 = vector.extract_strided_slice %56 {offsets = [0, 0], sizes = [2, 16], strides = [1, 1]} : vector<2x32xf32> to vector<2x16xf32>
    %58 = vector.extract_strided_slice %56 {offsets = [0, 16], sizes = [2, 16], strides = [1, 1]} : vector<2x32xf32> to vector<2x16xf32>
    %59 = vector.extract_strided_slice %27 {offsets = [0, 32], sizes = [2, 16], strides = [1, 1]} : vector<2x48xf32> to vector<2x16xf32>
    %60 = vector.extract_strided_slice %48 {offsets = [0, 32], sizes = [2, 16], strides = [1, 1]} : vector<2x48xf32> to vector<2x16xf32>
    %61 = arith.addf %60, %14 : vector<2x16xf32>
    %62 = arith.mulf %57, %61 : vector<2x16xf32>
    %63 = arith.addf %59, %62 : vector<2x16xf32>
    %64 = math.tanh %63 : vector<2x16xf32>
    %65 = arith.subf %16, %64 : vector<2x16xf32>
    %66 = arith.mulf %58, %65 : vector<2x16xf32>
    %67 = arith.addf %64, %66 : vector<2x16xf32>
    %c1_i32 = arith.constant 1 : i32
    %68 = tpu.concatenate %47, %67 in 1 : vector<2x16xf32>, vector<2x16xf32> -> vector<2x32xf32>
    %cst_23 = arith.constant dense<0.000000e+00> : vector<2x96xf32>
    %69 = tpu.matmul %68, %15, %cst_23 {dimension_numbers = #tpu.dot_dimension_numbers<[1], [0], [0], [1], [0, 0, 1, 1], [], []>} : vector<2x32xf32>, vector<32x96xf32>, vector<2x96xf32> -> vector<2x96xf32>
    %70 = arith.index_cast %c1_i32 : i32 to index
    %c0_24 = arith.constant 0 : index
    %c0_25 = arith.constant 0 : index
    %71 = vector.load %arg8[%70, %c0_24, %c0_25] : memref<8x2x96xf32, #tpu.memory_space<vmem>>, vector<1x2x96xf32>
    %72 = vector.shape_cast %71 : vector<1x2x96xf32> to vector<2x96xf32>
    %73 = vector.extract_strided_slice %72 {offsets = [0, 0], sizes = [2, 48], strides = [1, 1]} : vector<2x96xf32> to vector<2x48xf32>
    %c7_i32_26 = arith.constant 7 : i32
    %74 = arith.subi %c7_i32_26, %c1_i32 : i32
    %75 = arith.index_cast %74 : i32 to index
    %c0_27 = arith.constant 0 : index
    %c0_28 = arith.constant 0 : index
    %76 = vector.load %arg8[%75, %c0_27, %c0_28] : memref<8x2x96xf32, #tpu.memory_space<vmem>>, vector<1x2x96xf32>
    %77 = vector.shape_cast %76 : vector<1x2x96xf32> to vector<2x96xf32>
    %78 = vector.extract_strided_slice %77 {offsets = [0, 48], sizes = [2, 48], strides = [1, 1]} : vector<2x96xf32> to vector<2x48xf32>
    %79 = vector.extract_strided_slice %69 {offsets = [0, 0], sizes = [2, 48], strides = [1, 1]} : vector<2x96xf32> to vector<2x48xf32>
    %80 = vector.extract_strided_slice %73 {offsets = [0, 0], sizes = [2, 32], strides = [1, 1]} : vector<2x48xf32> to vector<2x32xf32>
    %81 = vector.extract_strided_slice %79 {offsets = [0, 0], sizes = [2, 32], strides = [1, 1]} : vector<2x48xf32> to vector<2x32xf32>
    %82 = arith.addf %80, %81 : vector<2x32xf32>
    %83 = arith.negf %82 : vector<2x32xf32>
    %84 = math.exp %83 : vector<2x32xf32>
    %cst_29 = arith.constant 1.000000e+00 : f32
    %85 = vector.broadcast %cst_29 : f32 to vector<2x32xf32>
    %86 = arith.addf %85, %84 : vector<2x32xf32>
    %87 = arith.divf %85, %86 : vector<2x32xf32>
    %88 = vector.extract_strided_slice %87 {offsets = [0, 0], sizes = [2, 16], strides = [1, 1]} : vector<2x32xf32> to vector<2x16xf32>
    %89 = vector.extract_strided_slice %87 {offsets = [0, 16], sizes = [2, 16], strides = [1, 1]} : vector<2x32xf32> to vector<2x16xf32>
    %90 = vector.extract_strided_slice %73 {offsets = [0, 32], sizes = [2, 16], strides = [1, 1]} : vector<2x48xf32> to vector<2x16xf32>
    %91 = vector.extract_strided_slice %79 {offsets = [0, 32], sizes = [2, 16], strides = [1, 1]} : vector<2x48xf32> to vector<2x16xf32>
    %92 = arith.addf %91, %11 : vector<2x16xf32>
    %93 = arith.mulf %88, %92 : vector<2x16xf32>
    %94 = arith.addf %90, %93 : vector<2x16xf32>
    %95 = math.tanh %94 : vector<2x16xf32>
    %96 = arith.subf %47, %95 : vector<2x16xf32>
    %97 = arith.mulf %89, %96 : vector<2x16xf32>
    %98 = arith.addf %95, %97 : vector<2x16xf32>
    %99 = vector.extract_strided_slice %69 {offsets = [0, 48], sizes = [2, 48], strides = [1, 1]} : vector<2x96xf32> to vector<2x48xf32>
    %100 = vector.extract_strided_slice %78 {offsets = [0, 0], sizes = [2, 32], strides = [1, 1]} : vector<2x48xf32> to vector<2x32xf32>
    %101 = vector.extract_strided_slice %99 {offsets = [0, 0], sizes = [2, 32], strides = [1, 1]} : vector<2x48xf32> to vector<2x32xf32>
    %102 = arith.addf %100, %101 : vector<2x32xf32>
    %103 = arith.negf %102 : vector<2x32xf32>
    %104 = math.exp %103 : vector<2x32xf32>
    %cst_30 = arith.constant 1.000000e+00 : f32
    %105 = vector.broadcast %cst_30 : f32 to vector<2x32xf32>
    %106 = arith.addf %105, %104 : vector<2x32xf32>
    %107 = arith.divf %105, %106 : vector<2x32xf32>
    %108 = vector.extract_strided_slice %107 {offsets = [0, 0], sizes = [2, 16], strides = [1, 1]} : vector<2x32xf32> to vector<2x16xf32>
    %109 = vector.extract_strided_slice %107 {offsets = [0, 16], sizes = [2, 16], strides = [1, 1]} : vector<2x32xf32> to vector<2x16xf32>
    %110 = vector.extract_strided_slice %78 {offsets = [0, 32], sizes = [2, 16], strides = [1, 1]} : vector<2x48xf32> to vector<2x16xf32>
    %111 = vector.extract_strided_slice %99 {offsets = [0, 32], sizes = [2, 16], strides = [1, 1]} : vector<2x48xf32> to vector<2x16xf32>
    %112 = arith.addf %111, %14 : vector<2x16xf32>
    %113 = arith.mulf %108, %112 : vector<2x16xf32>
    %114 = arith.addf %110, %113 : vector<2x16xf32>
    %115 = math.tanh %114 : vector<2x16xf32>
    %116 = arith.subf %67, %115 : vector<2x16xf32>
    %117 = arith.mulf %109, %116 : vector<2x16xf32>
    %118 = arith.addf %115, %117 : vector<2x16xf32>
    %c2_i32 = arith.constant 2 : i32
    %119 = tpu.concatenate %98, %118 in 1 : vector<2x16xf32>, vector<2x16xf32> -> vector<2x32xf32>
    %cst_31 = arith.constant dense<0.000000e+00> : vector<2x96xf32>
    %120 = tpu.matmul %119, %15, %cst_31 {dimension_numbers = #tpu.dot_dimension_numbers<[1], [0], [0], [1], [0, 0, 1, 1], [], []>} : vector<2x32xf32>, vector<32x96xf32>, vector<2x96xf32> -> vector<2x96xf32>
    %121 = arith.index_cast %c2_i32 : i32 to index
    %c0_32 = arith.constant 0 : index
    %c0_33 = arith.constant 0 : index
    %122 = vector.load %arg8[%121, %c0_32, %c0_33] : memref<8x2x96xf32, #tpu.memory_space<vmem>>, vector<1x2x96xf32>
    %123 = vector.shape_cast %122 : vector<1x2x96xf32> to vector<2x96xf32>
    %124 = vector.extract_strided_slice %123 {offsets = [0, 0], sizes = [2, 48], strides = [1, 1]} : vector<2x96xf32> to vector<2x48xf32>
    %c7_i32_34 = arith.constant 7 : i32
    %125 = arith.subi %c7_i32_34, %c2_i32 : i32
    %126 = arith.index_cast %125 : i32 to index
    %c0_35 = arith.constant 0 : index
    %c0_36 = arith.constant 0 : index
    %127 = vector.load %arg8[%126, %c0_35, %c0_36] : memref<8x2x96xf32, #tpu.memory_space<vmem>>, vector<1x2x96xf32>
    %128 = vector.shape_cast %127 : vector<1x2x96xf32> to vector<2x96xf32>
    %129 = vector.extract_strided_slice %128 {offsets = [0, 48], sizes = [2, 48], strides = [1, 1]} : vector<2x96xf32> to vector<2x48xf32>
    %130 = vector.extract_strided_slice %120 {offsets = [0, 0], sizes = [2, 48], strides = [1, 1]} : vector<2x96xf32> to vector<2x48xf32>
    %131 = vector.extract_strided_slice %124 {offsets = [0, 0], sizes = [2, 32], strides = [1, 1]} : vector<2x48xf32> to vector<2x32xf32>
    %132 = vector.extract_strided_slice %130 {offsets = [0, 0], sizes = [2, 32], strides = [1, 1]} : vector<2x48xf32> to vector<2x32xf32>
    %133 = arith.addf %131, %132 : vector<2x32xf32>
    %134 = arith.negf %133 : vector<2x32xf32>
    %135 = math.exp %134 : vector<2x32xf32>
    %cst_37 = arith.constant 1.000000e+00 : f32
    %136 = vector.broadcast %cst_37 : f32 to vector<2x32xf32>
    %137 = arith.addf %136, %135 : vector<2x32xf32>
    %138 = arith.divf %136, %137 : vector<2x32xf32>
    %139 = vector.extract_strided_slice %138 {offsets = [0, 0], sizes = [2, 16], strides = [1, 1]} : vector<2x32xf32> to vector<2x16xf32>
    %140 = vector.extract_strided_slice %138 {offsets = [0, 16], sizes = [2, 16], strides = [1, 1]} : vector<2x32xf32> to vector<2x16xf32>
    %141 = vector.extract_strided_slice %124 {offsets = [0, 32], sizes = [2, 16], strides = [1, 1]} : vector<2x48xf32> to vector<2x16xf32>
    %142 = vector.extract_strided_slice %130 {offsets = [0, 32], sizes = [2, 16], strides = [1, 1]} : vector<2x48xf32> to vector<2x16xf32>
    %143 = arith.addf %142, %11 : vector<2x16xf32>
    %144 = arith.mulf %139, %143 : vector<2x16xf32>
    %145 = arith.addf %141, %144 : vector<2x16xf32>
    %146 = math.tanh %145 : vector<2x16xf32>
    %147 = arith.subf %98, %146 : vector<2x16xf32>
    %148 = arith.mulf %140, %147 : vector<2x16xf32>
    %149 = arith.addf %146, %148 : vector<2x16xf32>
    %150 = vector.extract_strided_slice %120 {offsets = [0, 48], sizes = [2, 48], strides = [1, 1]} : vector<2x96xf32> to vector<2x48xf32>
    %151 = vector.extract_strided_slice %129 {offsets = [0, 0], sizes = [2, 32], strides = [1, 1]} : vector<2x48xf32> to vector<2x32xf32>
    %152 = vector.extract_strided_slice %150 {offsets = [0, 0], sizes = [2, 32], strides = [1, 1]} : vector<2x48xf32> to vector<2x32xf32>
    %153 = arith.addf %151, %152 : vector<2x32xf32>
    %154 = arith.negf %153 : vector<2x32xf32>
    %155 = math.exp %154 : vector<2x32xf32>
    %cst_38 = arith.constant 1.000000e+00 : f32
    %156 = vector.broadcast %cst_38 : f32 to vector<2x32xf32>
    %157 = arith.addf %156, %155 : vector<2x32xf32>
    %158 = arith.divf %156, %157 : vector<2x32xf32>
    %159 = vector.extract_strided_slice %158 {offsets = [0, 0], sizes = [2, 16], strides = [1, 1]} : vector<2x32xf32> to vector<2x16xf32>
    %160 = vector.extract_strided_slice %158 {offsets = [0, 16], sizes = [2, 16], strides = [1, 1]} : vector<2x32xf32> to vector<2x16xf32>
    %161 = vector.extract_strided_slice %129 {offsets = [0, 32], sizes = [2, 16], strides = [1, 1]} : vector<2x48xf32> to vector<2x16xf32>
    %162 = vector.extract_strided_slice %150 {offsets = [0, 32], sizes = [2, 16], strides = [1, 1]} : vector<2x48xf32> to vector<2x16xf32>
    %163 = arith.addf %162, %14 : vector<2x16xf32>
    %164 = arith.mulf %159, %163 : vector<2x16xf32>
    %165 = arith.addf %161, %164 : vector<2x16xf32>
    %166 = math.tanh %165 : vector<2x16xf32>
    %167 = arith.subf %118, %166 : vector<2x16xf32>
    %168 = arith.mulf %160, %167 : vector<2x16xf32>
    %169 = arith.addf %166, %168 : vector<2x16xf32>
    %c3_i32 = arith.constant 3 : i32
    %170 = tpu.concatenate %149, %169 in 1 : vector<2x16xf32>, vector<2x16xf32> -> vector<2x32xf32>
    %cst_39 = arith.constant dense<0.000000e+00> : vector<2x96xf32>
    %171 = tpu.matmul %170, %15, %cst_39 {dimension_numbers = #tpu.dot_dimension_numbers<[1], [0], [0], [1], [0, 0, 1, 1], [], []>} : vector<2x32xf32>, vector<32x96xf32>, vector<2x96xf32> -> vector<2x96xf32>
    %172 = arith.index_cast %c3_i32 : i32 to index
    %c0_40 = arith.constant 0 : index
    %c0_41 = arith.constant 0 : index
    %173 = vector.load %arg8[%172, %c0_40, %c0_41] : memref<8x2x96xf32, #tpu.memory_space<vmem>>, vector<1x2x96xf32>
    %174 = vector.shape_cast %173 : vector<1x2x96xf32> to vector<2x96xf32>
    %175 = vector.extract_strided_slice %174 {offsets = [0, 0], sizes = [2, 48], strides = [1, 1]} : vector<2x96xf32> to vector<2x48xf32>
    %c7_i32_42 = arith.constant 7 : i32
    %176 = arith.subi %c7_i32_42, %c3_i32 : i32
    %177 = arith.index_cast %176 : i32 to index
    %c0_43 = arith.constant 0 : index
    %c0_44 = arith.constant 0 : index
    %178 = vector.load %arg8[%177, %c0_43, %c0_44] : memref<8x2x96xf32, #tpu.memory_space<vmem>>, vector<1x2x96xf32>
    %179 = vector.shape_cast %178 : vector<1x2x96xf32> to vector<2x96xf32>
    %180 = vector.extract_strided_slice %179 {offsets = [0, 48], sizes = [2, 48], strides = [1, 1]} : vector<2x96xf32> to vector<2x48xf32>
    %181 = vector.extract_strided_slice %171 {offsets = [0, 0], sizes = [2, 48], strides = [1, 1]} : vector<2x96xf32> to vector<2x48xf32>
    %182 = vector.extract_strided_slice %175 {offsets = [0, 0], sizes = [2, 32], strides = [1, 1]} : vector<2x48xf32> to vector<2x32xf32>
    %183 = vector.extract_strided_slice %181 {offsets = [0, 0], sizes = [2, 32], strides = [1, 1]} : vector<2x48xf32> to vector<2x32xf32>
    %184 = arith.addf %182, %183 : vector<2x32xf32>
    %185 = arith.negf %184 : vector<2x32xf32>
    %186 = math.exp %185 : vector<2x32xf32>
    %cst_45 = arith.constant 1.000000e+00 : f32
    %187 = vector.broadcast %cst_45 : f32 to vector<2x32xf32>
    %188 = arith.addf %187, %186 : vector<2x32xf32>
    %189 = arith.divf %187, %188 : vector<2x32xf32>
    %190 = vector.extract_strided_slice %189 {offsets = [0, 0], sizes = [2, 16], strides = [1, 1]} : vector<2x32xf32> to vector<2x16xf32>
    %191 = vector.extract_strided_slice %189 {offsets = [0, 16], sizes = [2, 16], strides = [1, 1]} : vector<2x32xf32> to vector<2x16xf32>
    %192 = vector.extract_strided_slice %175 {offsets = [0, 32], sizes = [2, 16], strides = [1, 1]} : vector<2x48xf32> to vector<2x16xf32>
    %193 = vector.extract_strided_slice %181 {offsets = [0, 32], sizes = [2, 16], strides = [1, 1]} : vector<2x48xf32> to vector<2x16xf32>
    %194 = arith.addf %193, %11 : vector<2x16xf32>
    %195 = arith.mulf %190, %194 : vector<2x16xf32>
    %196 = arith.addf %192, %195 : vector<2x16xf32>
    %197 = math.tanh %196 : vector<2x16xf32>
    %198 = arith.subf %149, %197 : vector<2x16xf32>
    %199 = arith.mulf %191, %198 : vector<2x16xf32>
    %200 = arith.addf %197, %199 : vector<2x16xf32>
    %201 = vector.extract_strided_slice %171 {offsets = [0, 48], sizes = [2, 48], strides = [1, 1]} : vector<2x96xf32> to vector<2x48xf32>
    %202 = vector.extract_strided_slice %180 {offsets = [0, 0], sizes = [2, 32], strides = [1, 1]} : vector<2x48xf32> to vector<2x32xf32>
    %203 = vector.extract_strided_slice %201 {offsets = [0, 0], sizes = [2, 32], strides = [1, 1]} : vector<2x48xf32> to vector<2x32xf32>
    %204 = arith.addf %202, %203 : vector<2x32xf32>
    %205 = arith.negf %204 : vector<2x32xf32>
    %206 = math.exp %205 : vector<2x32xf32>
    %cst_46 = arith.constant 1.000000e+00 : f32
    %207 = vector.broadcast %cst_46 : f32 to vector<2x32xf32>
    %208 = arith.addf %207, %206 : vector<2x32xf32>
    %209 = arith.divf %207, %208 : vector<2x32xf32>
    %210 = vector.extract_strided_slice %209 {offsets = [0, 0], sizes = [2, 16], strides = [1, 1]} : vector<2x32xf32> to vector<2x16xf32>
    %211 = vector.extract_strided_slice %209 {offsets = [0, 16], sizes = [2, 16], strides = [1, 1]} : vector<2x32xf32> to vector<2x16xf32>
    %212 = vector.extract_strided_slice %180 {offsets = [0, 32], sizes = [2, 16], strides = [1, 1]} : vector<2x48xf32> to vector<2x16xf32>
    %213 = vector.extract_strided_slice %201 {offsets = [0, 32], sizes = [2, 16], strides = [1, 1]} : vector<2x48xf32> to vector<2x16xf32>
    %214 = arith.addf %213, %14 : vector<2x16xf32>
    %215 = arith.mulf %210, %214 : vector<2x16xf32>
    %216 = arith.addf %212, %215 : vector<2x16xf32>
    %217 = math.tanh %216 : vector<2x16xf32>
    %218 = arith.subf %169, %217 : vector<2x16xf32>
    %219 = arith.mulf %211, %218 : vector<2x16xf32>
    %220 = arith.addf %217, %219 : vector<2x16xf32>
    %c4_i32 = arith.constant 4 : i32
    %221 = tpu.concatenate %200, %220 in 1 : vector<2x16xf32>, vector<2x16xf32> -> vector<2x32xf32>
    %cst_47 = arith.constant dense<0.000000e+00> : vector<2x96xf32>
    %222 = tpu.matmul %221, %15, %cst_47 {dimension_numbers = #tpu.dot_dimension_numbers<[1], [0], [0], [1], [0, 0, 1, 1], [], []>} : vector<2x32xf32>, vector<32x96xf32>, vector<2x96xf32> -> vector<2x96xf32>
    %223 = arith.index_cast %c4_i32 : i32 to index
    %c0_48 = arith.constant 0 : index
    %c0_49 = arith.constant 0 : index
    %224 = vector.load %arg8[%223, %c0_48, %c0_49] : memref<8x2x96xf32, #tpu.memory_space<vmem>>, vector<1x2x96xf32>
    %225 = vector.shape_cast %224 : vector<1x2x96xf32> to vector<2x96xf32>
    %226 = vector.extract_strided_slice %225 {offsets = [0, 0], sizes = [2, 48], strides = [1, 1]} : vector<2x96xf32> to vector<2x48xf32>
    %c7_i32_50 = arith.constant 7 : i32
    %227 = arith.subi %c7_i32_50, %c4_i32 : i32
    %228 = arith.index_cast %227 : i32 to index
    %c0_51 = arith.constant 0 : index
    %c0_52 = arith.constant 0 : index
    %229 = vector.load %arg8[%228, %c0_51, %c0_52] : memref<8x2x96xf32, #tpu.memory_space<vmem>>, vector<1x2x96xf32>
    %230 = vector.shape_cast %229 : vector<1x2x96xf32> to vector<2x96xf32>
    %231 = vector.extract_strided_slice %230 {offsets = [0, 48], sizes = [2, 48], strides = [1, 1]} : vector<2x96xf32> to vector<2x48xf32>
    %232 = vector.extract_strided_slice %222 {offsets = [0, 0], sizes = [2, 48], strides = [1, 1]} : vector<2x96xf32> to vector<2x48xf32>
    %233 = vector.extract_strided_slice %226 {offsets = [0, 0], sizes = [2, 32], strides = [1, 1]} : vector<2x48xf32> to vector<2x32xf32>
    %234 = vector.extract_strided_slice %232 {offsets = [0, 0], sizes = [2, 32], strides = [1, 1]} : vector<2x48xf32> to vector<2x32xf32>
    %235 = arith.addf %233, %234 : vector<2x32xf32>
    %236 = arith.negf %235 : vector<2x32xf32>
    %237 = math.exp %236 : vector<2x32xf32>
    %cst_53 = arith.constant 1.000000e+00 : f32
    %238 = vector.broadcast %cst_53 : f32 to vector<2x32xf32>
    %239 = arith.addf %238, %237 : vector<2x32xf32>
    %240 = arith.divf %238, %239 : vector<2x32xf32>
    %241 = vector.extract_strided_slice %240 {offsets = [0, 0], sizes = [2, 16], strides = [1, 1]} : vector<2x32xf32> to vector<2x16xf32>
    %242 = vector.extract_strided_slice %240 {offsets = [0, 16], sizes = [2, 16], strides = [1, 1]} : vector<2x32xf32> to vector<2x16xf32>
    %243 = vector.extract_strided_slice %226 {offsets = [0, 32], sizes = [2, 16], strides = [1, 1]} : vector<2x48xf32> to vector<2x16xf32>
    %244 = vector.extract_strided_slice %232 {offsets = [0, 32], sizes = [2, 16], strides = [1, 1]} : vector<2x48xf32> to vector<2x16xf32>
    %245 = arith.addf %244, %11 : vector<2x16xf32>
    %246 = arith.mulf %241, %245 : vector<2x16xf32>
    %247 = arith.addf %243, %246 : vector<2x16xf32>
    %248 = math.tanh %247 : vector<2x16xf32>
    %249 = arith.subf %200, %248 : vector<2x16xf32>
    %250 = arith.mulf %242, %249 : vector<2x16xf32>
    %251 = arith.addf %248, %250 : vector<2x16xf32>
    %252 = vector.extract_strided_slice %222 {offsets = [0, 48], sizes = [2, 48], strides = [1, 1]} : vector<2x96xf32> to vector<2x48xf32>
    %253 = vector.extract_strided_slice %231 {offsets = [0, 0], sizes = [2, 32], strides = [1, 1]} : vector<2x48xf32> to vector<2x32xf32>
    %254 = vector.extract_strided_slice %252 {offsets = [0, 0], sizes = [2, 32], strides = [1, 1]} : vector<2x48xf32> to vector<2x32xf32>
    %255 = arith.addf %253, %254 : vector<2x32xf32>
    %256 = arith.negf %255 : vector<2x32xf32>
    %257 = math.exp %256 : vector<2x32xf32>
    %cst_54 = arith.constant 1.000000e+00 : f32
    %258 = vector.broadcast %cst_54 : f32 to vector<2x32xf32>
    %259 = arith.addf %258, %257 : vector<2x32xf32>
    %260 = arith.divf %258, %259 : vector<2x32xf32>
    %261 = vector.extract_strided_slice %260 {offsets = [0, 0], sizes = [2, 16], strides = [1, 1]} : vector<2x32xf32> to vector<2x16xf32>
    %262 = vector.extract_strided_slice %260 {offsets = [0, 16], sizes = [2, 16], strides = [1, 1]} : vector<2x32xf32> to vector<2x16xf32>
    %263 = vector.extract_strided_slice %231 {offsets = [0, 32], sizes = [2, 16], strides = [1, 1]} : vector<2x48xf32> to vector<2x16xf32>
    %264 = vector.extract_strided_slice %252 {offsets = [0, 32], sizes = [2, 16], strides = [1, 1]} : vector<2x48xf32> to vector<2x16xf32>
    %265 = arith.addf %264, %14 : vector<2x16xf32>
    %266 = arith.mulf %261, %265 : vector<2x16xf32>
    %267 = arith.addf %263, %266 : vector<2x16xf32>
    %268 = math.tanh %267 : vector<2x16xf32>
    %269 = arith.subf %220, %268 : vector<2x16xf32>
    %270 = arith.mulf %262, %269 : vector<2x16xf32>
    %271 = arith.addf %268, %270 : vector<2x16xf32>
    %c5_i32 = arith.constant 5 : i32
    %272 = tpu.concatenate %251, %271 in 1 : vector<2x16xf32>, vector<2x16xf32> -> vector<2x32xf32>
    %cst_55 = arith.constant dense<0.000000e+00> : vector<2x96xf32>
    %273 = tpu.matmul %272, %15, %cst_55 {dimension_numbers = #tpu.dot_dimension_numbers<[1], [0], [0], [1], [0, 0, 1, 1], [], []>} : vector<2x32xf32>, vector<32x96xf32>, vector<2x96xf32> -> vector<2x96xf32>
    %274 = arith.index_cast %c5_i32 : i32 to index
    %c0_56 = arith.constant 0 : index
    %c0_57 = arith.constant 0 : index
    %275 = vector.load %arg8[%274, %c0_56, %c0_57] : memref<8x2x96xf32, #tpu.memory_space<vmem>>, vector<1x2x96xf32>
    %276 = vector.shape_cast %275 : vector<1x2x96xf32> to vector<2x96xf32>
    %277 = vector.extract_strided_slice %276 {offsets = [0, 0], sizes = [2, 48], strides = [1, 1]} : vector<2x96xf32> to vector<2x48xf32>
    %c7_i32_58 = arith.constant 7 : i32
    %278 = arith.subi %c7_i32_58, %c5_i32 : i32
    %279 = arith.index_cast %278 : i32 to index
    %c0_59 = arith.constant 0 : index
    %c0_60 = arith.constant 0 : index
    %280 = vector.load %arg8[%279, %c0_59, %c0_60] : memref<8x2x96xf32, #tpu.memory_space<vmem>>, vector<1x2x96xf32>
    %281 = vector.shape_cast %280 : vector<1x2x96xf32> to vector<2x96xf32>
    %282 = vector.extract_strided_slice %281 {offsets = [0, 48], sizes = [2, 48], strides = [1, 1]} : vector<2x96xf32> to vector<2x48xf32>
    %283 = vector.extract_strided_slice %273 {offsets = [0, 0], sizes = [2, 48], strides = [1, 1]} : vector<2x96xf32> to vector<2x48xf32>
    %284 = vector.extract_strided_slice %277 {offsets = [0, 0], sizes = [2, 32], strides = [1, 1]} : vector<2x48xf32> to vector<2x32xf32>
    %285 = vector.extract_strided_slice %283 {offsets = [0, 0], sizes = [2, 32], strides = [1, 1]} : vector<2x48xf32> to vector<2x32xf32>
    %286 = arith.addf %284, %285 : vector<2x32xf32>
    %287 = arith.negf %286 : vector<2x32xf32>
    %288 = math.exp %287 : vector<2x32xf32>
    %cst_61 = arith.constant 1.000000e+00 : f32
    %289 = vector.broadcast %cst_61 : f32 to vector<2x32xf32>
    %290 = arith.addf %289, %288 : vector<2x32xf32>
    %291 = arith.divf %289, %290 : vector<2x32xf32>
    %292 = vector.extract_strided_slice %291 {offsets = [0, 0], sizes = [2, 16], strides = [1, 1]} : vector<2x32xf32> to vector<2x16xf32>
    %293 = vector.extract_strided_slice %291 {offsets = [0, 16], sizes = [2, 16], strides = [1, 1]} : vector<2x32xf32> to vector<2x16xf32>
    %294 = vector.extract_strided_slice %277 {offsets = [0, 32], sizes = [2, 16], strides = [1, 1]} : vector<2x48xf32> to vector<2x16xf32>
    %295 = vector.extract_strided_slice %283 {offsets = [0, 32], sizes = [2, 16], strides = [1, 1]} : vector<2x48xf32> to vector<2x16xf32>
    %296 = arith.addf %295, %11 : vector<2x16xf32>
    %297 = arith.mulf %292, %296 : vector<2x16xf32>
    %298 = arith.addf %294, %297 : vector<2x16xf32>
    %299 = math.tanh %298 : vector<2x16xf32>
    %300 = arith.subf %251, %299 : vector<2x16xf32>
    %301 = arith.mulf %293, %300 : vector<2x16xf32>
    %302 = arith.addf %299, %301 : vector<2x16xf32>
    %303 = vector.extract_strided_slice %273 {offsets = [0, 48], sizes = [2, 48], strides = [1, 1]} : vector<2x96xf32> to vector<2x48xf32>
    %304 = vector.extract_strided_slice %282 {offsets = [0, 0], sizes = [2, 32], strides = [1, 1]} : vector<2x48xf32> to vector<2x32xf32>
    %305 = vector.extract_strided_slice %303 {offsets = [0, 0], sizes = [2, 32], strides = [1, 1]} : vector<2x48xf32> to vector<2x32xf32>
    %306 = arith.addf %304, %305 : vector<2x32xf32>
    %307 = arith.negf %306 : vector<2x32xf32>
    %308 = math.exp %307 : vector<2x32xf32>
    %cst_62 = arith.constant 1.000000e+00 : f32
    %309 = vector.broadcast %cst_62 : f32 to vector<2x32xf32>
    %310 = arith.addf %309, %308 : vector<2x32xf32>
    %311 = arith.divf %309, %310 : vector<2x32xf32>
    %312 = vector.extract_strided_slice %311 {offsets = [0, 0], sizes = [2, 16], strides = [1, 1]} : vector<2x32xf32> to vector<2x16xf32>
    %313 = vector.extract_strided_slice %311 {offsets = [0, 16], sizes = [2, 16], strides = [1, 1]} : vector<2x32xf32> to vector<2x16xf32>
    %314 = vector.extract_strided_slice %282 {offsets = [0, 32], sizes = [2, 16], strides = [1, 1]} : vector<2x48xf32> to vector<2x16xf32>
    %315 = vector.extract_strided_slice %303 {offsets = [0, 32], sizes = [2, 16], strides = [1, 1]} : vector<2x48xf32> to vector<2x16xf32>
    %316 = arith.addf %315, %14 : vector<2x16xf32>
    %317 = arith.mulf %312, %316 : vector<2x16xf32>
    %318 = arith.addf %314, %317 : vector<2x16xf32>
    %319 = math.tanh %318 : vector<2x16xf32>
    %320 = arith.subf %271, %319 : vector<2x16xf32>
    %321 = arith.mulf %313, %320 : vector<2x16xf32>
    %322 = arith.addf %319, %321 : vector<2x16xf32>
    %c6_i32 = arith.constant 6 : i32
    %323 = tpu.concatenate %302, %322 in 1 : vector<2x16xf32>, vector<2x16xf32> -> vector<2x32xf32>
    %cst_63 = arith.constant dense<0.000000e+00> : vector<2x96xf32>
    %324 = tpu.matmul %323, %15, %cst_63 {dimension_numbers = #tpu.dot_dimension_numbers<[1], [0], [0], [1], [0, 0, 1, 1], [], []>} : vector<2x32xf32>, vector<32x96xf32>, vector<2x96xf32> -> vector<2x96xf32>
    %325 = arith.index_cast %c6_i32 : i32 to index
    %c0_64 = arith.constant 0 : index
    %c0_65 = arith.constant 0 : index
    %326 = vector.load %arg8[%325, %c0_64, %c0_65] : memref<8x2x96xf32, #tpu.memory_space<vmem>>, vector<1x2x96xf32>
    %327 = vector.shape_cast %326 : vector<1x2x96xf32> to vector<2x96xf32>
    %328 = vector.extract_strided_slice %327 {offsets = [0, 0], sizes = [2, 48], strides = [1, 1]} : vector<2x96xf32> to vector<2x48xf32>
    %c7_i32_66 = arith.constant 7 : i32
    %329 = arith.subi %c7_i32_66, %c6_i32 : i32
    %330 = arith.index_cast %329 : i32 to index
    %c0_67 = arith.constant 0 : index
    %c0_68 = arith.constant 0 : index
    %331 = vector.load %arg8[%330, %c0_67, %c0_68] : memref<8x2x96xf32, #tpu.memory_space<vmem>>, vector<1x2x96xf32>
    %332 = vector.shape_cast %331 : vector<1x2x96xf32> to vector<2x96xf32>
    %333 = vector.extract_strided_slice %332 {offsets = [0, 48], sizes = [2, 48], strides = [1, 1]} : vector<2x96xf32> to vector<2x48xf32>
    %334 = vector.extract_strided_slice %324 {offsets = [0, 0], sizes = [2, 48], strides = [1, 1]} : vector<2x96xf32> to vector<2x48xf32>
    %335 = vector.extract_strided_slice %328 {offsets = [0, 0], sizes = [2, 32], strides = [1, 1]} : vector<2x48xf32> to vector<2x32xf32>
    %336 = vector.extract_strided_slice %334 {offsets = [0, 0], sizes = [2, 32], strides = [1, 1]} : vector<2x48xf32> to vector<2x32xf32>
    %337 = arith.addf %335, %336 : vector<2x32xf32>
    %338 = arith.negf %337 : vector<2x32xf32>
    %339 = math.exp %338 : vector<2x32xf32>
    %cst_69 = arith.constant 1.000000e+00 : f32
    %340 = vector.broadcast %cst_69 : f32 to vector<2x32xf32>
    %341 = arith.addf %340, %339 : vector<2x32xf32>
    %342 = arith.divf %340, %341 : vector<2x32xf32>
    %343 = vector.extract_strided_slice %342 {offsets = [0, 0], sizes = [2, 16], strides = [1, 1]} : vector<2x32xf32> to vector<2x16xf32>
    %344 = vector.extract_strided_slice %342 {offsets = [0, 16], sizes = [2, 16], strides = [1, 1]} : vector<2x32xf32> to vector<2x16xf32>
    %345 = vector.extract_strided_slice %328 {offsets = [0, 32], sizes = [2, 16], strides = [1, 1]} : vector<2x48xf32> to vector<2x16xf32>
    %346 = vector.extract_strided_slice %334 {offsets = [0, 32], sizes = [2, 16], strides = [1, 1]} : vector<2x48xf32> to vector<2x16xf32>
    %347 = arith.addf %346, %11 : vector<2x16xf32>
    %348 = arith.mulf %343, %347 : vector<2x16xf32>
    %349 = arith.addf %345, %348 : vector<2x16xf32>
    %350 = math.tanh %349 : vector<2x16xf32>
    %351 = arith.subf %302, %350 : vector<2x16xf32>
    %352 = arith.mulf %344, %351 : vector<2x16xf32>
    %353 = arith.addf %350, %352 : vector<2x16xf32>
    %354 = vector.extract_strided_slice %324 {offsets = [0, 48], sizes = [2, 48], strides = [1, 1]} : vector<2x96xf32> to vector<2x48xf32>
    %355 = vector.extract_strided_slice %333 {offsets = [0, 0], sizes = [2, 32], strides = [1, 1]} : vector<2x48xf32> to vector<2x32xf32>
    %356 = vector.extract_strided_slice %354 {offsets = [0, 0], sizes = [2, 32], strides = [1, 1]} : vector<2x48xf32> to vector<2x32xf32>
    %357 = arith.addf %355, %356 : vector<2x32xf32>
    %358 = arith.negf %357 : vector<2x32xf32>
    %359 = math.exp %358 : vector<2x32xf32>
    %cst_70 = arith.constant 1.000000e+00 : f32
    %360 = vector.broadcast %cst_70 : f32 to vector<2x32xf32>
    %361 = arith.addf %360, %359 : vector<2x32xf32>
    %362 = arith.divf %360, %361 : vector<2x32xf32>
    %363 = vector.extract_strided_slice %362 {offsets = [0, 0], sizes = [2, 16], strides = [1, 1]} : vector<2x32xf32> to vector<2x16xf32>
    %364 = vector.extract_strided_slice %362 {offsets = [0, 16], sizes = [2, 16], strides = [1, 1]} : vector<2x32xf32> to vector<2x16xf32>
    %365 = vector.extract_strided_slice %333 {offsets = [0, 32], sizes = [2, 16], strides = [1, 1]} : vector<2x48xf32> to vector<2x16xf32>
    %366 = vector.extract_strided_slice %354 {offsets = [0, 32], sizes = [2, 16], strides = [1, 1]} : vector<2x48xf32> to vector<2x16xf32>
    %367 = arith.addf %366, %14 : vector<2x16xf32>
    %368 = arith.mulf %363, %367 : vector<2x16xf32>
    %369 = arith.addf %365, %368 : vector<2x16xf32>
    %370 = math.tanh %369 : vector<2x16xf32>
    %371 = arith.subf %322, %370 : vector<2x16xf32>
    %372 = arith.mulf %364, %371 : vector<2x16xf32>
    %373 = arith.addf %370, %372 : vector<2x16xf32>
    %c7_i32_71 = arith.constant 7 : i32
    %374 = tpu.concatenate %353, %373 in 1 : vector<2x16xf32>, vector<2x16xf32> -> vector<2x32xf32>
    %cst_72 = arith.constant dense<0.000000e+00> : vector<2x96xf32>
    %375 = tpu.matmul %374, %15, %cst_72 {dimension_numbers = #tpu.dot_dimension_numbers<[1], [0], [0], [1], [0, 0, 1, 1], [], []>} : vector<2x32xf32>, vector<32x96xf32>, vector<2x96xf32> -> vector<2x96xf32>
    %376 = arith.index_cast %c7_i32_71 : i32 to index
    %c0_73 = arith.constant 0 : index
    %c0_74 = arith.constant 0 : index
    %377 = vector.load %arg8[%376, %c0_73, %c0_74] : memref<8x2x96xf32, #tpu.memory_space<vmem>>, vector<1x2x96xf32>
    %378 = vector.shape_cast %377 : vector<1x2x96xf32> to vector<2x96xf32>
    %379 = vector.extract_strided_slice %378 {offsets = [0, 0], sizes = [2, 48], strides = [1, 1]} : vector<2x96xf32> to vector<2x48xf32>
    %c7_i32_75 = arith.constant 7 : i32
    %380 = arith.subi %c7_i32_75, %c7_i32_71 : i32
    %381 = arith.index_cast %380 : i32 to index
    %c0_76 = arith.constant 0 : index
    %c0_77 = arith.constant 0 : index
    %382 = vector.load %arg8[%381, %c0_76, %c0_77] : memref<8x2x96xf32, #tpu.memory_space<vmem>>, vector<1x2x96xf32>
    %383 = vector.shape_cast %382 : vector<1x2x96xf32> to vector<2x96xf32>
    %384 = vector.extract_strided_slice %383 {offsets = [0, 48], sizes = [2, 48], strides = [1, 1]} : vector<2x96xf32> to vector<2x48xf32>
    %385 = vector.extract_strided_slice %375 {offsets = [0, 0], sizes = [2, 48], strides = [1, 1]} : vector<2x96xf32> to vector<2x48xf32>
    %386 = vector.extract_strided_slice %379 {offsets = [0, 0], sizes = [2, 32], strides = [1, 1]} : vector<2x48xf32> to vector<2x32xf32>
    %387 = vector.extract_strided_slice %385 {offsets = [0, 0], sizes = [2, 32], strides = [1, 1]} : vector<2x48xf32> to vector<2x32xf32>
    %388 = arith.addf %386, %387 : vector<2x32xf32>
    %389 = arith.negf %388 : vector<2x32xf32>
    %390 = math.exp %389 : vector<2x32xf32>
    %cst_78 = arith.constant 1.000000e+00 : f32
    %391 = vector.broadcast %cst_78 : f32 to vector<2x32xf32>
    %392 = arith.addf %391, %390 : vector<2x32xf32>
    %393 = arith.divf %391, %392 : vector<2x32xf32>
    %394 = vector.extract_strided_slice %393 {offsets = [0, 0], sizes = [2, 16], strides = [1, 1]} : vector<2x32xf32> to vector<2x16xf32>
    %395 = vector.extract_strided_slice %393 {offsets = [0, 16], sizes = [2, 16], strides = [1, 1]} : vector<2x32xf32> to vector<2x16xf32>
    %396 = vector.extract_strided_slice %379 {offsets = [0, 32], sizes = [2, 16], strides = [1, 1]} : vector<2x48xf32> to vector<2x16xf32>
    %397 = vector.extract_strided_slice %385 {offsets = [0, 32], sizes = [2, 16], strides = [1, 1]} : vector<2x48xf32> to vector<2x16xf32>
    %398 = arith.addf %397, %11 : vector<2x16xf32>
    %399 = arith.mulf %394, %398 : vector<2x16xf32>
    %400 = arith.addf %396, %399 : vector<2x16xf32>
    %401 = math.tanh %400 : vector<2x16xf32>
    %402 = arith.subf %353, %401 : vector<2x16xf32>
    %403 = arith.mulf %395, %402 : vector<2x16xf32>
    %404 = arith.addf %401, %403 : vector<2x16xf32>
    %405 = vector.extract_strided_slice %375 {offsets = [0, 48], sizes = [2, 48], strides = [1, 1]} : vector<2x96xf32> to vector<2x48xf32>
    %406 = vector.extract_strided_slice %384 {offsets = [0, 0], sizes = [2, 32], strides = [1, 1]} : vector<2x48xf32> to vector<2x32xf32>
    %407 = vector.extract_strided_slice %405 {offsets = [0, 0], sizes = [2, 32], strides = [1, 1]} : vector<2x48xf32> to vector<2x32xf32>
    %408 = arith.addf %406, %407 : vector<2x32xf32>
    %409 = arith.negf %408 : vector<2x32xf32>
    %410 = math.exp %409 : vector<2x32xf32>
    %cst_79 = arith.constant 1.000000e+00 : f32
    %411 = vector.broadcast %cst_79 : f32 to vector<2x32xf32>
    %412 = arith.addf %411, %410 : vector<2x32xf32>
    %413 = arith.divf %411, %412 : vector<2x32xf32>
    %414 = vector.extract_strided_slice %413 {offsets = [0, 0], sizes = [2, 16], strides = [1, 1]} : vector<2x32xf32> to vector<2x16xf32>
    %415 = vector.extract_strided_slice %413 {offsets = [0, 16], sizes = [2, 16], strides = [1, 1]} : vector<2x32xf32> to vector<2x16xf32>
    %416 = vector.extract_strided_slice %384 {offsets = [0, 32], sizes = [2, 16], strides = [1, 1]} : vector<2x48xf32> to vector<2x16xf32>
    %417 = vector.extract_strided_slice %405 {offsets = [0, 32], sizes = [2, 16], strides = [1, 1]} : vector<2x48xf32> to vector<2x16xf32>
    %418 = arith.addf %417, %14 : vector<2x16xf32>
    %419 = arith.mulf %414, %418 : vector<2x16xf32>
    %420 = arith.addf %416, %419 : vector<2x16xf32>
    %421 = math.tanh %420 : vector<2x16xf32>
    %422 = arith.subf %373, %421 : vector<2x16xf32>
    %423 = arith.mulf %415, %422 : vector<2x16xf32>
    %424 = arith.addf %421, %423 : vector<2x16xf32>
    %c8_i32 = arith.constant 8 : i32
    %425 = tpu.concatenate %404, %424 in 1 : vector<2x16xf32>, vector<2x16xf32> -> vector<2x32xf32>
    %c0_80 = arith.constant 0 : index
    %c0_81 = arith.constant 0 : index
    %426 = vector.load %arg7[%c0_80, %c0_81] : memref<2x32xf32, #tpu.memory_space<vmem>>, vector<2x32xf32>
    tpu.vector_store %arg7[%c0_80, %c0_81], %425 {strides = array<i32>} : memref<2x32xf32, #tpu.memory_space<vmem>>, vector<2x32xf32>,
    return
  }
  func.func @transform_0(%arg0: i32) -> (i32, i32, i32) {
    %c0_i32 = arith.constant 0 : i32
    %c0_i32_0 = arith.constant 0 : i32
    %c0_i32_1 = arith.constant 0 : i32
    return %c0_i32, %arg0, %c0_i32_0 : i32, i32, i32
  }
  func.func @transform_1(%arg0: i32) -> (i32, i32) {
    %c0_i32 = arith.constant 0 : i32
    %c0_i32_0 = arith.constant 0 : i32
    %c0_i32_1 = arith.constant 0 : i32
    return %c0_i32, %c0_i32_0 : i32, i32
  }
  func.func @transform_2(%arg0: i32) -> (i32, i32) {
    %c0_i32 = arith.constant 0 : i32
    %c0_i32_0 = arith.constant 0 : i32
    %c0_i32_1 = arith.constant 0 : i32
    return %c0_i32, %c0_i32_0 : i32, i32
  }
  func.func @transform_3(%arg0: i32) -> (i32, i32) {
    %c0_i32 = arith.constant 0 : i32
    %c0_i32_0 = arith.constant 0 : i32
    %c0_i32_1 = arith.constant 0 : i32
    return %c0_i32, %c0_i32_0 : i32, i32
  }
  func.func @transform_4(%arg0: i32) -> (i32, i32) {
    %c0_i32 = arith.constant 0 : i32
    %c0_i32_0 = arith.constant 0 : i32
    %c0_i32_1 = arith.constant 0 : i32
    return %c0_i32, %c0_i32_0 : i32, i32
  }
  func.func @transform_5(%arg0: i32) -> (i32, i32) {
    %c0_i32 = arith.constant 0 : i32
    %c0_i32_0 = arith.constant 0 : i32
    %c0_i32_1 = arith.constant 0 : i32
    return %c0_i32, %c0_i32_0 : i32, i32
  }
  func.func @transform_6(%arg0: i32) -> (i32, i32) {
    %c0_i32 = arith.constant 0 : i32
    %c0_i32_0 = arith.constant 0 : i32
    return %arg0, %c0_i32 : i32, i32
  }
}

</mosaic_0001>

<bundles_post_ra>
// kernel: tpu_custom_call.1
= control target key start
LH: loop header
LB: loop body
LE: loop exit
PB: predicated region body
PF: predicated region fallthrough
CT: control target
= control target key end

     0   :  { %11 = vsyncpa [#allocation4], 0  ;;  %s1711_s0 = inlined_call_operand.hbm [shape: f32[8,2,32], index: 0, kind: input, shape index: {}]   ;;  %s1712_s1 = inlined_call_operand.hbm [shape: f32[32,96], index: 1, kind: input, shape index: {}]   ;;  %s1713_s2 = inlined_call_operand.vmem [shape: f32[1,96], index: 2, kind: input, shape index: {}]   ;;  %s1714_s3 = inlined_call_operand.hbm [shape: f32[32,96], index: 3, kind: input, shape index: {}]   ;;  %s1715_s4 = inlined_call_operand.vmem [shape: f32[1,16], index: 4, kind: input, shape index: {}]   ;;  %s1716_s5 = inlined_call_operand.vmem [shape: f32[1,16], index: 5, kind: input, shape index: {}]   ;;  %s1717_s6 = inlined_call_operand.hbm [shape: f32[2,32], index: 6, kind: output, shape index: {}]  }
   0x1   :  { %12 = vsyncpa [#allocation7], 0  ;;  %s31_s23 = sshll.u32 %s1712_s1, 4  ;;  %s32_s23 = int_to_ptr.hbm [resolvable:$true] %s31_s23 }
   0x2   :  { %13 = vsyncpa [#allocation5], 0  ;;  %s1401_s24 = smov [#allocation6]   ;;  %s18_s28 = sshll.u32 %s1711_s0, 4  ;;  %s19_s28 = int_to_ptr.hbm [resolvable:$true] %s18_s28 }
   0x3   :  { %s33_s25 = sshll.u32 %s1401_s24, 4  ;;  %s1402_s29 = smov 128   ;;  %s34_s25 = int_to_ptr.vmem [resolvable:$true] %s33_s25 }
   0x4   :  { %s1403_s30 = smov 8   ;;  %s1404_s7 = smov [#allocation3]  }
   0x5   :  { %39 = dma.hbm_to_vmem [thread:$0]  %s32_s23, 512, %s34_s25, [#allocation7], %s1402_s29, %s1402_s29, %s1403_s30  }
   0x6   :  { %s20_s8 = sshll.u32 %s1404_s7, 4  ;;  %s1405_s9 = smov 32   ;;  %s21_s8 = int_to_ptr.vmem [resolvable:$true] %s20_s8 }
   0x7   :  { %s1406_s10 = smov 2   ;;  %s46_s12 = sshll.u32 %s1714_s3, 4  ;;  %s47_s12 = int_to_ptr.hbm [resolvable:$true] %s46_s12 }
   0x8   :  { %26 = dma.hbm_to_vmem [thread:$0]  %s19_s28, 256, %s21_s8, [#allocation4], %s1405_s9, %s1405_s9, %s1406_s10  }
   0x9   :  { %s1407_s13 = smov [#allocation8]  }
   0xa   :  { %s48_s14 = sshll.u32 %s1407_s13, 4  ;;  %s49_s14 = int_to_ptr.vmem [resolvable:$true] %s48_s14 }
   0xb   :  { %54 = dma.hbm_to_vmem [thread:$0]  %s47_s12, 512, %s49_s14, [#allocation7], %s1402_s29, %s1402_s29, %s1403_s30  }
   0xc   :  { %1395 = dma.done.wait [#allocation4], 256  }
   0xd   :  { %1396 = vsyncadd [#allocation4], 4294967040 }
   0xe   :  { %1397 = dma.done.wait [#allocation7], 1024  }
   0xf   :  { %1398 = vsyncadd [#allocation7], 4294966272  ;;  %v172_v0 = vld [vmem:[#allocation8 + $0x18] sm:$0xff]  ;;  %v1461_v2 = vld [vmem:[#allocation8 + $0x10] sm:$0xff]  ;;  %v1408_v16 = vmov 0.0   ;;  %vm112_vm0 = vcmask 261120  }
  0x10   :  { %v74_v1 = vld [vmem:[#allocation6 + $0x18] sm:$0xff]  ;;  %188 = vmatpush.msra.mxu1 %v172_v0  ;;  %v73_v3 = vld [vmem:[#allocation6 + $0x10] sm:$0xff]  ;;  %v170_v4 = vld [vmem:[#allocation8 + $0x8] sm:$0xff]  ;;  %316 = vmatpush.msra.mxu2 %v172_v0  ;;  %s1409_s16 = smov 80   ;;  %vm154_vm1 = vcmask 779264   ;;  %s1412_s19 = smov 16  }
  0x11   :  { %129 = vmatpush.msra.mxu0 %v74_v1  ;;  %v72_v5 = vld [vmem:[#allocation6 + $0x8] sm:$0xff]  ;;  %v1463_v6 = vld [vmem:[#allocation8] sm:$0xff]  ;;  %v76_v8 = vld [vmem:[#allocation3] sm:$0x3]  ;;  %438 = vmatpush.msra.mxu3 %v172_v0  ;;  %s1413_s20 = smov 64   ;;  %vm299_vm10 = vcmask 130048  }
  0x12   :  { %v71_v7 = vld [vmem:[#allocation6] sm:$0xff]  ;;  %189 = vmatpush.msra.mxu1 %v1461_v2  ;;  %v77_v9 = vld [vmem:[#allocation3 + $0x2] sm:$0x3]  ;;  %v78_v10 = vld [vmem:[#allocation3 + $0x4] sm:$0x3]  ;;  %317 = vmatpush.msra.mxu2 %v1461_v2  ;;  %s1414_s21 = smov [#allocation9]  }
  0x13   :  { %130 = vmatpush.msra.mxu0 %v73_v3  ;;  %v79_v11 = vld [vmem:[#allocation3 + $0x6] sm:$0x3]  ;;  %95 = vst [vmem:[#allocation1] ss:$4 sm:$0xff] %v76_v8  ;;  %v1198_v12 = vld [vmem:[%s1715_s4] ss:$0 sm:$0xff]  ;;  %439 = vmatpush.msra.mxu3 %v1461_v2 }
  0x14   :  { %190 = vmatpush.msra.mxu1 %v170_v4  ;;  %97 = vst [vmem:[#allocation1 + $0x1] ss:$4 sm:$0xff] %v77_v9  ;;  %v80_v13 = vld [vmem:[#allocation3 + $0x8] sm:$0x3]  ;;  %219 = vrot.lane.b32.xlu0 %v1198_v12, %s1405_s9  ;;  %v81_v14 = vld [vmem:[#allocation3 + $0xa] sm:$0x3] }
  0x15   :  { %131 = vmatpush.msra.mxu0 %v72_v5  ;;  %99 = vst [vmem:[#allocation1 + $0x2] ss:$4 sm:$0xff] %v78_v10  ;;  %318 = vmatpush.msra.mxu2 %v170_v4  ;;  %v82_v15 = vld [vmem:[#allocation3 + $0xc] sm:$0x3]  ;;  %v83_v17 = vld [vmem:[#allocation3 + $0xe] sm:$0x3] }
  0x16   :  { %191 = vmatpush.msra.mxu1 %v1463_v6  ;;  %101 = vst [vmem:[#allocation1 + $0x3] ss:$4 sm:$0xff] %v79_v11  ;;  %440 = vmatpush.msra.mxu3 %v170_v4  ;;  %v1199_v18 = vld [vmem:[%s1716_s5] ss:$0 sm:$0xff]  ;;  %s1410_s5 = smov 96   ;;  %s1146_s22 = sshll.u32 %s1414_s21, 4  ;;  %s1147_s22 = int_to_ptr.vmem [resolvable:$true] %s1146_s22 }
  0x17   :  { %132 = vmatpush.msra.mxu0 %v71_v7  ;;  %192 = vmatmul.f32.vlgmr.msra.gmra.mxu1 %v1408_v16  ;;  %103 = vst [vmem:[#allocation1 + $0x20] ss:$4 sm:$0xff] %v80_v13  ;;  %v1200_v24 = vld [vmem:[%s1713_s2] ss:$0 sm:$0xff]  ;;  %s1411_s2 = smov 112   ;;  %s1148_s25 = sshll.u32 %s1717_s6, 4  ;;  %s1149_s25 = int_to_ptr.hbm [resolvable:$true] %s1148_s25 }
  0x18   :  { %319 = vmatpush.msra.mxu2 %v1463_v6  ;;  %105 = vst [vmem:[#allocation1 + $0x21] ss:$4 sm:$0xff] %v81_v14  ;;  %560 = vmatpush.msrb.mxu1 %v172_v0 }
  0x19   :  { %107 = vst [vmem:[#allocation1 + $0x22] ss:$4 sm:$0xff] %v82_v15  ;;  %918 = vmatpush.msrb.mxu0 %v172_v0  ;;  %441 = vmatpush.msra.mxu3 %v1463_v6 }
  0x1a   :  { %682 = vmatpush.msrb.mxu2 %v172_v0  ;;  %109 = vst [vmem:[#allocation1 + $0x23] ss:$4 sm:$0xff] %v83_v17  ;;  %561 = vmatpush.msrb.mxu1 %v1461_v2 }
  0x1b   :  { %800 = vmatpush.msrb.mxu3 %v172_v0  ;;  %919 = vmatpush.msrb.mxu0 %v1461_v2 }
  0x1c   :  { %683 = vmatpush.msrb.mxu2 %v1461_v2  ;;  %562 = vmatpush.msrb.mxu1 %v170_v4 }
  0x1d   :  { %v110_v19 = vld.sshfl [vmem:[#allocation1] sm:$0xff pattern:$0x73625140]  ;;  %265 = vrot.lane.b32.xlu0 %v1199_v18, %s1409_s16  ;;  %801 = vmatpush.msrb.mxu3 %v1461_v2 }
  0x1e   :  { %684 = vmatpush.msrb.mxu2 %v170_v4  ;;  %1159 = vmatmul.msk.f32.vlgmr.msra.gmra.mxu0 %vm112_vm0, %v110_v19 }
  0x1f   :  { %563 = vmatpush.msrb.mxu1 %v1463_v6  ;;  %920 = vmatpush.msrb.mxu0 %v170_v4 }
  0x20   :  { %685 = vmatpush.msrb.mxu2 %v1463_v6  ;;  %802 = vmatpush.msrb.mxu3 %v170_v4 }
  0x21   :  { %1036 = vmatpush.msra.mxu1 %v172_v0  ;;  %921 = vmatpush.msrb.mxu0 %v1463_v6  ;;  %v111_v20 = vld.sshfl [vmem:[#allocation1 + $0x20] sm:$0xff pattern:$0x73625140] }
  0x22   :  { %803 = vmatpush.msrb.mxu3 %v1463_v6 }
  0x23   :  { %1037 = vmatpush.msra.mxu1 %v1461_v2 }
  0x25   :  { %1038 = vmatpush.msra.mxu1 %v170_v4 }
  0x26   :  { %1160 = vmatmul.msk.f32.gmra.mxu0 %vm112_vm0, %v111_v20 }
  0x27   :  { %1039 = vmatpush.msra.mxu1 %v1463_v6 }
  0x86   :  { %v1490_v21 = vpop.permute.xlu0 %219 }
  0x8f   :  { %v1497_v25 = vpop.permute.xlu0 %265 }
  0x94   :  { %v193_v22 = vpop.f32.mrf.mxu1 }
  0x95   :  { %v222_v23 = vadd.f32 %v1490_v21, %v193_v22  ;;  %v268_v28 = vadd.f32 %v1497_v25, %v193_v22 }
  0x97   :  { %224 = vrot.lane.b32.xlu1 %v222_v23, %s1410_s5 }
  0x9b   :  { %v134_v26 = vpop.f32.mrf.mxu0 }
  0x9c   :  { %v135_v27 = vadd.f32 %v1200_v24, %v134_v26 }
  0x9e   :  { %v142_v29 = vrot.slane %v135_v27, 2  ;;  %v143_v30 = vrot.slane %v135_v27, 4  ;;  %v144_v31 = vrot.slane %v135_v27, 6  ;;  %155 = vst.msk [vmem:[#allocation2] sm:$0x3] %vm154_vm1, %v135_v27 }
  0x9f   :  { %270 = vrot.lane.b32.xlu1 %v268_v28, %s1410_s5 }
  0xa0   :  { %156 = vst.msk [vmem:[#allocation2 + $0x2] sm:$0x3] %vm154_vm1, %v142_v29 }
  0xa1   :  { %157 = vst.msk [vmem:[#allocation2 + $0x4] sm:$0x3] %vm154_vm1, %v143_v30 }
  0xa2   :  { %158 = vst.msk [vmem:[#allocation2 + $0x6] sm:$0x3] %vm154_vm1, %v144_v31 }
  0xa3   :  { %v137_v32 = vpop.f32.mrf.mxu0 }
  0xa4   :  { %v138_v33 = vadd.f32 %v1200_v24, %v137_v32 }
  0xa5   :  { %v196_v37 = vld [vmem:[#allocation2] sm:$0x3] }
  0xa6   :  { %v145_v34 = vrot.slane %v138_v33, 2  ;;  %v146_v35 = vrot.slane %v138_v33, 4  ;;  %v147_v36 = vrot.slane %v138_v33, 6  ;;  %159 = vst.msk [vmem:[#allocation2 + $0x8] sm:$0x3] %vm154_vm1, %v138_v33  ;;  %v199_v38 = vadd.f32 %v196_v37, %v193_v22 }
  0xa7   :  { %v1529_v31 = vld [vmem:[#allocation2 + $0x2] sm:$0x3] }
  0xa8   :  { %160 = vst.msk [vmem:[#allocation2 + $0xa] sm:$0x3] %vm154_vm1, %v145_v34  ;;  %v1161_v39 = vmul.f32 -1.442695, %v199_v38 }
  0xa9   :  { %161 = vst.msk [vmem:[#allocation2 + $0xc] sm:$0x3] %vm154_vm1, %v146_v35 }
  0xaa   :  { %162 = vst.msk [vmem:[#allocation2 + $0xe] sm:$0x3] %vm154_vm1, %v147_v36  ;;  %1201 = vpow2.f32 %v1161_v39 }
  0xb0   :  { %v1202_v43 = vpop.eup %1201  ;;  %v1531_v32 = vld [vmem:[#allocation2 + $0xc] sm:$0x3] }
  0xb1   :  { %v198_v40 = vld [vmem:[#allocation2 + $0xe] sm:$0x3]  ;;  %v203_v44 = vadd.f32 1.0, %v1202_v43 }
  0xb2   :  { %v245_v41 = vadd.f32 %v198_v40, %v193_v22 }
  0xb3   :  { %v215_v55 = vand.u32 2147483648, %v203_v44  ;;  %vm209_vm3 = vweird.f32 %v203_v44  ;;  %v213_v56 = vand.u32 2147483647, %v203_v44 }
  0xb4   :  { %v1162_v42 = vmul.f32 -1.442695, %v245_v41 }
  0xb5   :  { %v216_v59 = vor.u32 1.1754944e-38, %v215_v55  ;;  %vm214_vm5 = vcmp.eq.f32.partialorder %v213_v56, 8.507059e+37 }
  0xb6   :  { %1203 = vpow2.f32 %v1162_v42 }
  0xb7   :  { %1205 = vrcp.f32 %v203_v44 }
  0xbc   :  { %v1204_v45 = vpop.eup %1203 }
  0xbd   :  { %v249_v46 = vadd.f32 1.0, %v1204_v45  ;;  %v1206_v47 = vpop.eup %1205 }
  0xbe   :  { %v205_v48 = vmul.f32 %v1206_v47, %v203_v44  ;;  %vm210_vm2 = vweird.f32 %v1206_v47 }
  0xbf   :  { %1207 = vrcp.f32 %v249_v46  ;;  %vm211_vm4 = vmor %vm209_vm3, %vm210_vm2  ;;  %v261_v0 = vand.u32 2147483648, %v249_v46  ;;  %vm255_vm7 = vweird.f32 %v249_v46  ;;  %v259_v1 = vand.u32 2147483647, %v249_v46 }
  0xc0   :  { %v206_v49 = vsub.f32 1.0, %v205_v48 }
  0xc1   :  { %v262_v3 = vor.u32 1.1754944e-38, %v261_v0  ;;  %vm260_vm9 = vcmp.eq.f32.partialorder %v259_v1, 8.507059e+37 }
  0xc2   :  { %v207_v51 = vmul.f32 %v1206_v47, %v206_v49 }
  0xc4   :  { %v208_v53 = vadd.f32 %v1206_v47, %v207_v51 }
  0xc5   :  { %v1208_v50 = vpop.eup %1207 }
  0xc6   :  { %v251_v52 = vmul.f32 %v1208_v50, %v249_v46  ;;  %v212_v57 = vsel %vm211_vm4, %v1206_v47, %v208_v53  ;;  %vm256_vm6 = vweird.f32 %v1208_v50 }
  0xc7   :  { %v217_v61 = vsel %vm214_vm5, %v216_v59, %v212_v57  ;;  %vm257_vm8 = vmor %vm255_vm7, %vm256_vm6 }
  0xc8   :  { %v252_v54 = vsub.f32 1.0, %v251_v52 }
  0xca   :  { %v253_v58 = vmul.f32 %v1208_v50, %v252_v54 }
  0xcc   :  { %v254_v63 = vadd.f32 %v1208_v50, %v253_v58 }
  0xce   :  { %v258_v2 = vsel %vm257_vm8, %v1208_v50, %v254_v63 }
  0xcf   :  { %v263_v5 = vsel %vm260_vm9, %v262_v3, %v258_v2 }
 0x109   :  { %v225_v60 = vpop.permute.xlu1 %224 }
 0x10a   :  { %v227_v62 = vmul.f32 %v225_v60, %v217_v61 }
 0x10c   :  { %229 = vrot.lane.b32.xlu2 %v227_v62, %s1405_s9 }
 0x111   :  { %v271_v4 = vpop.permute.xlu1 %270 }
 0x112   :  { %v273_v6 = vmul.f32 %v271_v4, %v263_v5 }
 0x114   :  { %275 = vrot.lane.b32.xlu2 %v273_v6, %s1405_s9 }
 0x166   :  { %v230_v7 = vpop.permute.xlu2 %229 }
 0x167   :  { %v232_v8 = vadd.f32 %v230_v7, %v196_v37 }
 0x169   :  { %1209 = vtanh.f32 %v232_v8 }
 0x16e   :  { %v276_v9 = vpop.permute.xlu2 %275 }
 0x16f   :  { %v1210_v10 = vpop.eup %1209  ;;  %v278_v11 = vadd.f32 %v276_v9, %v198_v40 }
 0x170   :  { %v234_v12 = vsub.f32 0.0, %v1210_v10 }
 0x171   :  { %1211 = vtanh.f32 %v278_v11 }
 0x172   :  { %236 = vrot.lane.b32.xlu0 %v234_v12, %s1411_s2 }
 0x177   :  { %v1212_v13 = vpop.eup %1211 }
 0x178   :  { %v280_v14 = vsub.f32 0.0, %v1212_v13 }
 0x17a   :  { %282 = vrot.lane.b32.xlu1 %v280_v14, %s1411_s2 }
 0x1e4   :  { %v237_v15 = vpop.permute.xlu0 %236 }
 0x1e5   :  { %v239_v16 = vmul.f32 %v237_v15, %v217_v61 }
 0x1e7   :  { %241 = vrot.lane.b32.xlu2 %v239_v16, %s1412_s19 }
 0x1ec   :  { %v283_v17 = vpop.permute.xlu1 %282 }
 0x1ed   :  { %v285_v18 = vmul.f32 %v283_v17, %v263_v5 }
 0x1ef   :  { %287 = vrot.lane.b32.xlu0 %v285_v18, %s1412_s19 }
 0x241   :  { %v242_v19 = vpop.permute.xlu2 %241 }
 0x242   :  { %v1515_v20 = vadd.f32 %v1210_v10, %v242_v19 }
 0x244   :  { %292 = vrot.lane.b32.xlu1 %v1515_v20, %s1410_s5 }
 0x261   :  { %v288_v22 = vpop.permute.xlu0 %287 }
 0x262   :  { %v1519_v23 = vadd.f32 %v1212_v13, %v288_v22 }
 0x264   :  { %296 = vrot.lane.b32.xlu2 %v1519_v23, %s1413_s20 }
 0x2b6   :  { %v293_v24 = vpop.permute.xlu1 %292 }
 0x2be   :  { %v297_v26 = vpop.permute.xlu2 %296 }
 0x2bf   :  { %v300_v27 = vsel %vm299_vm10, %v293_v24, %v297_v26  ;;  %v1559_v24 = vld [vmem:[#allocation2 + $0xa] sm:$0x3] }
 0x2c0   :  { %1163 = vmatmul.msk.f32.vlgmr.msra.gmra.mxu2 %vm112_vm0, %v300_v27 }
 0x343   :  { %v321_v28 = vpop.f32.mrf.mxu2 }
 0x344   :  { %v391_v29 = vadd.f32 %v321_v28, %v1497_v25  ;;  %v348_v30 = vadd.f32 %v321_v28, %v1490_v21  ;;  %v328_v33 = vadd.f32 %v1529_v31, %v321_v28  ;;  %v371_v34 = vadd.f32 %v1531_v32, %v321_v28 }
 0x346   :  { %393 = vrot.lane.b32.xlu1 %v391_v29, %s1410_s5  ;;  %350 = vrot.lane.b32.xlu0 %v348_v30, %s1410_s5  ;;  %v1164_v35 = vmul.f32 -1.442695, %v328_v33  ;;  %v1165_v36 = vmul.f32 -1.442695, %v371_v34  ;;  %v1562_v30 = vld [vmem:[#allocation2 + $0x4] sm:$0x3] }
 0x348   :  { %1213 = vpow2.f32 %v1164_v35 }
 0x349   :  { %1215 = vpow2.f32 %v1165_v36 }
 0x34e   :  { %v1214_v37 = vpop.eup %1213 }
 0x34f   :  { %v1216_v38 = vpop.eup %1215  ;;  %v332_v39 = vadd.f32 1.0, %v1214_v37 }
 0x350   :  { %v375_v40 = vadd.f32 1.0, %v1216_v38 }
 0x351   :  { %1217 = vrcp.f32 %v332_v39  ;;  %vm338_vm13 = vweird.f32 %v332_v39  ;;  %v344_v52 = vand.u32 2147483648, %v332_v39  ;;  %v342_v54 = vand.u32 2147483647, %v332_v39 }
 0x352   :  { %1219 = vrcp.f32 %v375_v40  ;;  %v387_v51 = vand.u32 2147483648, %v375_v40  ;;  %vm381_vm14 = vweird.f32 %v375_v40  ;;  %v385_v53 = vand.u32 2147483647, %v375_v40 }
 0x353   :  { %v345_v58 = vor.u32 1.1754944e-38, %v344_v52  ;;  %vm343_vm3 = vcmp.eq.f32.partialorder %v342_v54, 8.507059e+37 }
 0x354   :  { %v388_v57 = vor.u32 1.1754944e-38, %v387_v51  ;;  %vm386_vm2 = vcmp.eq.f32.partialorder %v385_v53, 8.507059e+37 }
 0x357   :  { %v1218_v41 = vpop.eup %1217 }
 0x358   :  { %v1220_v42 = vpop.eup %1219  ;;  %v334_v44 = vmul.f32 %v1218_v41, %v332_v39  ;;  %vm339_vm11 = vweird.f32 %v1218_v41 }
 0x359   :  { %v377_v43 = vmul.f32 %v1220_v42, %v375_v40  ;;  %vm382_vm12 = vweird.f32 %v1220_v42  ;;  %vm340_vm15 = vmor %vm338_vm13, %vm339_vm11 }
 0x35a   :  { %v335_v46 = vsub.f32 1.0, %v334_v44  ;;  %vm383_vm1 = vmor %vm381_vm14, %vm382_vm12 }
 0x35b   :  { %v378_v45 = vsub.f32 1.0, %v377_v43 }
 0x35c   :  { %v336_v48 = vmul.f32 %v1218_v41, %v335_v46 }
 0x35d   :  { %v379_v47 = vmul.f32 %v1220_v42, %v378_v45 }
 0x35e   :  { %v337_v50 = vadd.f32 %v1218_v41, %v336_v48 }
 0x35f   :  { %v380_v49 = vadd.f32 %v1220_v42, %v379_v47 }
 0x360   :  { %v341_v56 = vsel %vm340_vm15, %v1218_v41, %v337_v50 }
 0x361   :  { %v384_v55 = vsel %vm383_vm1, %v1220_v42, %v380_v49  ;;  %v346_v62 = vsel %vm343_vm3, %v345_v58, %v341_v56 }
 0x362   :  { %v389_v60 = vsel %vm386_vm2, %v388_v57, %v384_v55 }
 0x3b8   :  { %v394_v59 = vpop.permute.xlu1 %393  ;;  %v351_v61 = vpop.permute.xlu0 %350 }
 0x3b9   :  { %v396_v63 = vmul.f32 %v394_v59, %v389_v60  ;;  %v353_v0 = vmul.f32 %v351_v61, %v346_v62 }
 0x3bb   :  { %398 = vrot.lane.b32.xlu0 %v396_v63, %s1405_s9  ;;  %355 = vrot.lane.b32.xlu2 %v353_v0, %s1405_s9 }
 0x415   :  { %v356_v1 = vpop.permute.xlu2 %355 }
 0x416   :  { %v358_v2 = vadd.f32 %v356_v1, %v1529_v31 }
 0x418   :  { %1221 = vtanh.f32 %v358_v2 }
 0x41e   :  { %v1222_v3 = vpop.eup %1221 }
 0x41f   :  { %v360_v4 = vsub.f32 %v1515_v20, %v1222_v3 }
 0x421   :  { %362 = vrot.lane.b32.xlu1 %v360_v4, %s1411_s2 }
 0x42d   :  { %v399_v5 = vpop.permute.xlu0 %398 }
 0x42e   :  { %v401_v6 = vadd.f32 %v399_v5, %v1531_v32 }
 0x430   :  { %1223 = vtanh.f32 %v401_v6 }
 0x436   :  { %v1224_v7 = vpop.eup %1223 }
 0x437   :  { %v403_v8 = vsub.f32 %v1519_v23, %v1224_v7 }
 0x439   :  { %405 = vrot.lane.b32.xlu2 %v403_v8, %s1411_s2 }
 0x493   :  { %v363_v9 = vpop.permute.xlu1 %362  ;;  %v406_v10 = vpop.permute.xlu2 %405 }
 0x494   :  { %v365_v11 = vmul.f32 %v363_v9, %v346_v62  ;;  %v408_v12 = vmul.f32 %v406_v10, %v389_v60 }
 0x496   :  { %367 = vrot.lane.b32.xlu0 %v365_v11, %s1412_s19  ;;  %410 = vrot.lane.b32.xlu1 %v408_v12, %s1412_s19 }
 0x508   :  { %v368_v13 = vpop.permute.xlu0 %367  ;;  %v411_v14 = vpop.permute.xlu1 %410 }
 0x509   :  { %v1545_v15 = vadd.f32 %v1222_v3, %v368_v13  ;;  %v1547_v16 = vadd.f32 %v1224_v7, %v411_v14 }
 0x50b   :  { %415 = vrot.lane.b32.xlu2 %v1545_v15, %s1410_s5  ;;  %419 = vrot.lane.b32.xlu0 %v1547_v16, %s1413_s20 }
 0x565   :  { %v416_v17 = vpop.permute.xlu2 %415 }
 0x57d   :  { %v420_v18 = vpop.permute.xlu0 %419 }
 0x57e   :  { %v422_v19 = vsel %vm299_vm10, %v416_v17, %v420_v18 }
 0x57f   :  { %1166 = vmatmul.msk.f32.vlgmr.msra.gmra.mxu3 %vm112_vm0, %v422_v19  ;;  %v1589_v19 = vld [vmem:[#allocation2 + $0x6] sm:$0x3] }
 0x602   :  { %v443_v20 = vpop.f32.mrf.mxu3 }
 0x603   :  { %v513_v22 = vadd.f32 %v443_v20, %v1497_v25  ;;  %v470_v23 = vadd.f32 %v443_v20, %v1490_v21  ;;  %v493_v26 = vadd.f32 %v1559_v24, %v443_v20  ;;  %v450_v33 = vadd.f32 %v1562_v30, %v443_v20 }
 0x605   :  { %515 = vrot.lane.b32.xlu2 %v513_v22, %s1410_s5  ;;  %472 = vrot.lane.b32.xlu1 %v470_v23, %s1410_s5  ;;  %v1168_v27 = vmul.f32 -1.442695, %v493_v26  ;;  %v1167_v35 = vmul.f32 -1.442695, %v450_v33 }
 0x607   :  { %1225 = vpow2.f32 %v1168_v27  ;;  %v1592_v27 = vld [vmem:[#allocation2 + $0x8] sm:$0x3] }
 0x60d   :  { %v1226_v28 = vpop.eup %1225 }
 0x60e   :  { %v497_v29 = vadd.f32 1.0, %v1226_v28 }
 0x610   :  { %1227 = vrcp.f32 %v497_v29  ;;  %v509_v42 = vand.u32 2147483648, %v497_v29  ;;  %vm503_vm5 = vweird.f32 %v497_v29  ;;  %v507_v43 = vand.u32 2147483647, %v497_v29 }
 0x611   :  { %1229 = vpow2.f32 %v1167_v35 }
 0x612   :  { %v510_v45 = vor.u32 1.1754944e-38, %v509_v42  ;;  %vm508_vm7 = vcmp.eq.f32.partialorder %v507_v43, 8.507059e+37 }
 0x616   :  { %v1228_v34 = vpop.eup %1227 }
 0x617   :  { %v499_v36 = vmul.f32 %v1228_v34, %v497_v29  ;;  %v1230_v38 = vpop.eup %1229  ;;  %vm504_vm4 = vweird.f32 %v1228_v34 }
 0x618   :  { %v454_v40 = vadd.f32 1.0, %v1230_v38  ;;  %vm505_vm6 = vmor %vm503_vm5, %vm504_vm4 }
 0x619   :  { %v500_v37 = vsub.f32 1.0, %v499_v36 }
 0x61a   :  { %1231 = vrcp.f32 %v454_v40  ;;  %v466_v54 = vand.u32 2147483648, %v454_v40  ;;  %vm460_vm9 = vweird.f32 %v454_v40  ;;  %v464_v55 = vand.u32 2147483647, %v454_v40 }
 0x61b   :  { %v501_v39 = vmul.f32 %v1228_v34, %v500_v37 }
 0x61c   :  { %v467_v57 = vor.u32 1.1754944e-38, %v466_v54  ;;  %vm465_vm12 = vcmp.eq.f32.partialorder %v464_v55, 8.507059e+37 }
 0x61d   :  { %v502_v41 = vadd.f32 %v1228_v34, %v501_v39 }
 0x61f   :  { %v506_v44 = vsel %vm505_vm6, %v1228_v34, %v502_v41 }
 0x620   :  { %v511_v47 = vsel %vm508_vm7, %v510_v45, %v506_v44  ;;  %v1232_v49 = vpop.eup %1231 }
 0x621   :  { %v456_v50 = vmul.f32 %v1232_v49, %v454_v40  ;;  %vm461_vm8 = vweird.f32 %v1232_v49 }
 0x622   :  { %vm462_vm11 = vmor %vm460_vm9, %vm461_vm8 }
 0x623   :  { %v457_v51 = vsub.f32 1.0, %v456_v50 }
 0x625   :  { %v458_v52 = vmul.f32 %v1232_v49, %v457_v51 }
 0x627   :  { %v459_v53 = vadd.f32 %v1232_v49, %v458_v52 }
 0x629   :  { %v463_v56 = vsel %vm462_vm11, %v1232_v49, %v459_v53 }
 0x62a   :  { %v468_v59 = vsel %vm465_vm12, %v467_v57, %v463_v56 }
 0x65f   :  { %v516_v46 = vpop.permute.xlu2 %515 }
 0x660   :  { %v518_v48 = vmul.f32 %v516_v46, %v511_v47 }
 0x662   :  { %520 = vrot.lane.b32.xlu1 %v518_v48, %s1405_s9 }
 0x677   :  { %v473_v58 = vpop.permute.xlu1 %472 }
 0x678   :  { %v475_v60 = vmul.f32 %v473_v58, %v468_v59 }
 0x67a   :  { %477 = vrot.lane.b32.xlu0 %v475_v60, %s1405_s9 }
 0x6d4   :  { %v521_v61 = vpop.permute.xlu1 %520 }
 0x6d5   :  { %v523_v62 = vadd.f32 %v521_v61, %v1559_v24 }
 0x6d7   :  { %1233 = vtanh.f32 %v523_v62 }
 0x6dd   :  { %v1234_v63 = vpop.eup %1233 }
 0x6de   :  { %v525_v0 = vsub.f32 %v1547_v16, %v1234_v63 }
 0x6e0   :  { %527 = vrot.lane.b32.xlu0 %v525_v0, %s1411_s2 }
 0x6ec   :  { %v478_v1 = vpop.permute.xlu0 %477 }
 0x6ed   :  { %v480_v2 = vadd.f32 %v478_v1, %v1562_v30 }
 0x6ef   :  { %1235 = vtanh.f32 %v480_v2 }
 0x6f5   :  { %v1236_v3 = vpop.eup %1235 }
 0x6f6   :  { %v482_v4 = vsub.f32 %v1545_v15, %v1236_v3 }
 0x6f8   :  { %484 = vrot.lane.b32.xlu2 %v482_v4, %s1411_s2 }
 0x752   :  { %v485_v5 = vpop.permute.xlu2 %484  ;;  %v528_v6 = vpop.permute.xlu0 %527 }
 0x753   :  { %v487_v7 = vmul.f32 %v485_v5, %v468_v59  ;;  %v530_v8 = vmul.f32 %v528_v6, %v511_v47 }
 0x755   :  { %489 = vrot.lane.b32.xlu1 %v487_v7, %s1412_s19  ;;  %532 = vrot.lane.b32.xlu2 %v530_v8, %s1412_s19 }
 0x7af   :  { %v533_v9 = vpop.permute.xlu2 %532 }
 0x7b0   :  { %v1575_v10 = vadd.f32 %v1234_v63, %v533_v9 }
 0x7b2   :  { %541 = vrot.lane.b32.xlu1 %v1575_v10, %s1413_s20 }
 0x7c7   :  { %v490_v11 = vpop.permute.xlu1 %489 }
 0x7c8   :  { %v1579_v12 = vadd.f32 %v1236_v3, %v490_v11 }
 0x7ca   :  { %537 = vrot.lane.b32.xlu0 %v1579_v12, %s1410_s5 }
 0x824   :  { %v542_v13 = vpop.permute.xlu1 %541 }
 0x83c   :  { %v538_v14 = vpop.permute.xlu0 %537 }
 0x83d   :  { %v544_v15 = vsel %vm299_vm10, %v538_v14, %v542_v13 }
 0x83e   :  { %1169 = vmatmul.msk.f32.vlgmr.msrb.gmra.mxu1 %vm112_vm0, %v544_v15 }
 0x8bb   :  { %v565_v16 = vpop.f32.mrf.mxu1 }
 0x8bc   :  { %v635_v17 = vadd.f32 %v565_v16, %v1497_v25  ;;  %v592_v18 = vadd.f32 %v565_v16, %v1490_v21  ;;  %v572_v20 = vadd.f32 %v1589_v19, %v565_v16  ;;  %v615_v28 = vadd.f32 %v1592_v27, %v565_v16 }
 0x8be   :  { %637 = vrot.lane.b32.xlu0 %v635_v17, %s1410_s5  ;;  %594 = vrot.lane.b32.xlu2 %v592_v18, %s1410_s5  ;;  %v1170_v22 = vmul.f32 -1.442695, %v572_v20  ;;  %v1171_v33 = vmul.f32 -1.442695, %v615_v28 }
 0x8c0   :  { %1237 = vpow2.f32 %v1170_v22 }
 0x8c6   :  { %v1238_v23 = vpop.eup %1237 }
 0x8c7   :  { %v576_v26 = vadd.f32 1.0, %v1238_v23 }
 0x8c9   :  { %1239 = vrcp.f32 %v576_v26  ;;  %v588_v40 = vand.u32 2147483648, %v576_v26  ;;  %vm582_vm14 = vweird.f32 %v576_v26  ;;  %v586_v41 = vand.u32 2147483647, %v576_v26 }
 0x8ca   :  { %1241 = vpow2.f32 %v1171_v33 }
 0x8cb   :  { %v589_v43 = vor.u32 1.1754944e-38, %v588_v40  ;;  %vm587_vm1 = vcmp.eq.f32.partialorder %v586_v41, 8.507059e+37 }
 0x8cf   :  { %v1240_v29 = vpop.eup %1239 }
 0x8d0   :  { %v578_v34 = vmul.f32 %v1240_v29, %v576_v26  ;;  %v1242_v36 = vpop.eup %1241  ;;  %vm583_vm13 = vweird.f32 %v1240_v29 }
 0x8d1   :  { %v619_v38 = vadd.f32 1.0, %v1242_v36  ;;  %vm584_vm15 = vmor %vm582_vm14, %vm583_vm13 }
 0x8d2   :  { %v579_v35 = vsub.f32 1.0, %v578_v34 }
 0x8d3   :  { %1243 = vrcp.f32 %v619_v38  ;;  %v631_v52 = vand.u32 2147483648, %v619_v38  ;;  %vm625_vm3 = vweird.f32 %v619_v38  ;;  %v629_v53 = vand.u32 2147483647, %v619_v38 }
 0x8d4   :  { %v580_v37 = vmul.f32 %v1240_v29, %v579_v35 }
 0x8d5   :  { %v632_v55 = vor.u32 1.1754944e-38, %v631_v52  ;;  %vm630_vm5 = vcmp.eq.f32.partialorder %v629_v53, 8.507059e+37 }
 0x8d6   :  { %v581_v39 = vadd.f32 %v1240_v29, %v580_v37 }
 0x8d8   :  { %v585_v42 = vsel %vm584_vm15, %v1240_v29, %v581_v39 }
 0x8d9   :  { %v590_v45 = vsel %vm587_vm1, %v589_v43, %v585_v42  ;;  %v1244_v47 = vpop.eup %1243 }
 0x8da   :  { %v621_v48 = vmul.f32 %v1244_v47, %v619_v38  ;;  %vm626_vm2 = vweird.f32 %v1244_v47 }
 0x8db   :  { %vm627_vm4 = vmor %vm625_vm3, %vm626_vm2 }
 0x8dc   :  { %v622_v49 = vsub.f32 1.0, %v621_v48 }
 0x8de   :  { %v623_v50 = vmul.f32 %v1244_v47, %v622_v49 }
 0x8e0   :  { %v624_v51 = vadd.f32 %v1244_v47, %v623_v50 }
 0x8e2   :  { %v628_v54 = vsel %vm627_vm4, %v1244_v47, %v624_v51 }
 0x8e3   :  { %v633_v57 = vsel %vm630_vm5, %v632_v55, %v628_v54 }
 0x918   :  { %v595_v44 = vpop.permute.xlu2 %594 }
 0x919   :  { %v597_v46 = vmul.f32 %v595_v44, %v590_v45 }
 0x91b   :  { %599 = vrot.lane.b32.xlu1 %v597_v46, %s1405_s9 }
 0x930   :  { %v638_v56 = vpop.permute.xlu0 %637 }
 0x931   :  { %v640_v58 = vmul.f32 %v638_v56, %v633_v57 }
 0x933   :  { %642 = vrot.lane.b32.xlu2 %v640_v58, %s1405_s9 }
 0x98d   :  { %v643_v59 = vpop.permute.xlu2 %642  ;;  %v600_v60 = vpop.permute.xlu1 %599 }
 0x98e   :  { %v645_v61 = vadd.f32 %v643_v59, %v1592_v27  ;;  %v602_v62 = vadd.f32 %v600_v60, %v1589_v19 }
 0x990   :  { %1245 = vtanh.f32 %v645_v61 }
 0x991   :  { %1247 = vtanh.f32 %v602_v62 }
 0x996   :  { %v1246_v63 = vpop.eup %1245 }
 0x997   :  { %v1248_v0 = vpop.eup %1247  ;;  %v647_v1 = vsub.f32 %v1575_v10, %v1246_v63 }
 0x998   :  { %v604_v2 = vsub.f32 %v1579_v12, %v1248_v0 }
 0x999   :  { %649 = vrot.lane.b32.xlu1 %v647_v1, %s1411_s2 }
 0x99a   :  { %606 = vrot.lane.b32.xlu0 %v604_v2, %s1411_s2 }
 0xa0b   :  { %v650_v3 = vpop.permute.xlu1 %649 }
 0xa0c   :  { %v607_v4 = vpop.permute.xlu0 %606  ;;  %v652_v5 = vmul.f32 %v650_v3, %v633_v57 }
 0xa0d   :  { %v609_v6 = vmul.f32 %v607_v4, %v590_v45 }
 0xa0e   :  { %654 = vrot.lane.b32.xlu0 %v652_v5, %s1412_s19 }
 0xa0f   :  { %611 = vrot.lane.b32.xlu2 %v609_v6, %s1412_s19 }
 0xa69   :  { %v612_v7 = vpop.permute.xlu2 %611 }
 0xa6a   :  { %v1605_v8 = vadd.f32 %v1248_v0, %v612_v7 }
 0xa6c   :  { %659 = vrot.lane.b32.xlu1 %v1605_v8, %s1410_s5 }
 0xa80   :  { %v655_v9 = vpop.permute.xlu0 %654 }
 0xa81   :  { %v1609_v10 = vadd.f32 %v1246_v63, %v655_v9 }
 0xa83   :  { %663 = vrot.lane.b32.xlu2 %v1609_v10, %s1413_s20 }
 0xadd   :  { %v664_v11 = vpop.permute.xlu2 %663 }
 0xade   :  { %v660_v12 = vpop.permute.xlu1 %659 }
 0xadf   :  { %v666_v13 = vsel %vm299_vm10, %v660_v12, %v664_v11 }
 0xae0   :  { %1172 = vmatmul.msk.f32.vlgmr.msrb.gmra.mxu2 %vm112_vm0, %v666_v13 }
 0xb63   :  { %v687_v14 = vpop.f32.mrf.mxu2 }
 0xb64   :  { %v710_v15 = vadd.f32 %v687_v14, %v1490_v21  ;;  %v753_v16 = vadd.f32 %v687_v14, %v1497_v25  ;;  %v690_v17 = vadd.f32 %v687_v14, %v1592_v27  ;;  %v733_v18 = vadd.f32 %v687_v14, %v1589_v19 }
 0xb66   :  { %755 = vrot.lane.b32.xlu1 %v753_v16, %s1410_s5  ;;  %712 = vrot.lane.b32.xlu0 %v710_v15, %s1410_s5  ;;  %v1173_v20 = vmul.f32 -1.442695, %v690_v17  ;;  %v1174_v22 = vmul.f32 -1.442695, %v733_v18 }
 0xb68   :  { %1249 = vpow2.f32 %v1173_v20 }
 0xb69   :  { %1251 = vpow2.f32 %v1174_v22 }
 0xb6e   :  { %v1250_v23 = vpop.eup %1249 }
 0xb6f   :  { %v1252_v26 = vpop.eup %1251  ;;  %v694_v28 = vadd.f32 1.0, %v1250_v23 }
 0xb70   :  { %v737_v29 = vadd.f32 1.0, %v1252_v26 }
 0xb71   :  { %1253 = vrcp.f32 %v694_v28  ;;  %vm700_vm8 = vweird.f32 %v694_v28  ;;  %v706_v44 = vand.u32 2147483648, %v694_v28  ;;  %v704_v46 = vand.u32 2147483647, %v694_v28 }
 0xb72   :  { %1255 = vrcp.f32 %v737_v29  ;;  %v749_v43 = vand.u32 2147483648, %v737_v29  ;;  %vm743_vm9 = vweird.f32 %v737_v29  ;;  %v747_v45 = vand.u32 2147483647, %v737_v29 }
 0xb73   :  { %v707_v50 = vor.u32 1.1754944e-38, %v706_v44  ;;  %vm705_vm14 = vcmp.eq.f32.partialorder %v704_v46, 8.507059e+37 }
 0xb74   :  { %v750_v49 = vor.u32 1.1754944e-38, %v749_v43  ;;  %vm748_vm13 = vcmp.eq.f32.partialorder %v747_v45, 8.507059e+37 }
 0xb77   :  { %v1254_v33 = vpop.eup %1253 }
 0xb78   :  { %v1256_v34 = vpop.eup %1255  ;;  %v696_v36 = vmul.f32 %v1254_v33, %v694_v28  ;;  %vm701_vm6 = vweird.f32 %v1254_v33 }
 0xb79   :  { %v739_v35 = vmul.f32 %v1256_v34, %v737_v29  ;;  %vm744_vm7 = vweird.f32 %v1256_v34  ;;  %vm702_vm11 = vmor %vm700_vm8, %vm701_vm6 }
 0xb7a   :  { %v697_v38 = vsub.f32 1.0, %v696_v36  ;;  %vm745_vm12 = vmor %vm743_vm9, %vm744_vm7 }
 0xb7b   :  { %v740_v37 = vsub.f32 1.0, %v739_v35 }
 0xb7c   :  { %v698_v40 = vmul.f32 %v1254_v33, %v697_v38 }
 0xb7d   :  { %v741_v39 = vmul.f32 %v1256_v34, %v740_v37 }
 0xb7e   :  { %v699_v42 = vadd.f32 %v1254_v33, %v698_v40 }
 0xb7f   :  { %v742_v41 = vadd.f32 %v1256_v34, %v741_v39 }
 0xb80   :  { %v703_v48 = vsel %vm702_vm11, %v1254_v33, %v699_v42 }
 0xb81   :  { %v746_v47 = vsel %vm745_vm12, %v1256_v34, %v742_v41  ;;  %v708_v54 = vsel %vm705_vm14, %v707_v50, %v703_v48 }
 0xb82   :  { %v751_v52 = vsel %vm748_vm13, %v750_v49, %v746_v47 }
 0xbd8   :  { %v756_v51 = vpop.permute.xlu1 %755  ;;  %v713_v53 = vpop.permute.xlu0 %712 }
 0xbd9   :  { %v758_v55 = vmul.f32 %v756_v51, %v751_v52  ;;  %v715_v56 = vmul.f32 %v713_v53, %v708_v54 }
 0xbdb   :  { %760 = vrot.lane.b32.xlu0 %v758_v55, %s1405_s9  ;;  %717 = vrot.lane.b32.xlu2 %v715_v56, %s1405_s9 }
 0xc35   :  { %v718_v57 = vpop.permute.xlu2 %717 }
 0xc36   :  { %v720_v58 = vadd.f32 %v718_v57, %v1592_v27 }
 0xc38   :  { %1257 = vtanh.f32 %v720_v58 }
 0xc3e   :  { %v1258_v59 = vpop.eup %1257 }
 0xc3f   :  { %v722_v60 = vsub.f32 %v1605_v8, %v1258_v59 }
 0xc41   :  { %724 = vrot.lane.b32.xlu1 %v722_v60, %s1411_s2 }
 0xc4d   :  { %v761_v61 = vpop.permute.xlu0 %760 }
 0xc4e   :  { %v763_v62 = vadd.f32 %v761_v61, %v1589_v19 }
 0xc50   :  { %1259 = vtanh.f32 %v763_v62 }
 0xc56   :  { %v1260_v63 = vpop.eup %1259 }
 0xc57   :  { %v765_v0 = vsub.f32 %v1609_v10, %v1260_v63 }
 0xc59   :  { %767 = vrot.lane.b32.xlu2 %v765_v0, %s1411_s2 }
 0xcb3   :  { %v725_v1 = vpop.permute.xlu1 %724  ;;  %v768_v2 = vpop.permute.xlu2 %767 }
 0xcb4   :  { %v727_v3 = vmul.f32 %v725_v1, %v708_v54  ;;  %v770_v4 = vmul.f32 %v768_v2, %v751_v52 }
 0xcb6   :  { %729 = vrot.lane.b32.xlu0 %v727_v3, %s1412_s19  ;;  %772 = vrot.lane.b32.xlu1 %v770_v4, %s1412_s19 }
 0xd28   :  { %v730_v27 = vpop.permute.xlu0 %729  ;;  %v773_v5 = vpop.permute.xlu1 %772 }
 0xd29   :  { %v1631_v6 = vadd.f32 %v1258_v59, %v730_v27  ;;  %v1633_v7 = vadd.f32 %v1260_v63, %v773_v5 }
 0xd2b   :  { %777 = vrot.lane.b32.xlu2 %v1631_v6, %s1410_s5  ;;  %781 = vrot.lane.b32.xlu0 %v1633_v7, %s1413_s20 }
 0xd85   :  { %v778_v19 = vpop.permute.xlu2 %777 }
 0xd9d   :  { %v782_v8 = vpop.permute.xlu0 %781 }
 0xd9e   :  { %v784_v9 = vsel %vm299_vm10, %v778_v19, %v782_v8 }
 0xd9f   :  { %1175 = vmatmul.msk.f32.vlgmr.msrb.gmra.mxu3 %vm112_vm0, %v784_v9 }
 0xe22   :  { %v805_v10 = vpop.f32.mrf.mxu3 }
 0xe23   :  { %v828_v11 = vadd.f32 %v805_v10, %v1490_v21  ;;  %v871_v12 = vadd.f32 %v805_v10, %v1497_v25  ;;  %v851_v13 = vadd.f32 %v805_v10, %v1562_v30  ;;  %v808_v17 = vadd.f32 %v805_v10, %v1559_v24 }
 0xe25   :  { %873 = vrot.lane.b32.xlu2 %v871_v12, %s1410_s5  ;;  %830 = vrot.lane.b32.xlu1 %v828_v11, %s1410_s5  ;;  %v1177_v14 = vmul.f32 -1.442695, %v851_v13  ;;  %v1176_v20 = vmul.f32 -1.442695, %v808_v17 }
 0xe27   :  { %1261 = vpow2.f32 %v1177_v14 }
 0xe2d   :  { %v1262_v15 = vpop.eup %1261 }
 0xe2e   :  { %v855_v16 = vadd.f32 1.0, %v1262_v15 }
 0xe30   :  { %1263 = vrcp.f32 %v855_v16  ;;  %v867_v34 = vand.u32 2147483648, %v855_v16  ;;  %vm861_vm1 = vweird.f32 %v855_v16  ;;  %v865_v35 = vand.u32 2147483647, %v855_v16 }
 0xe31   :  { %1265 = vpow2.f32 %v1176_v20 }
 0xe32   :  { %v868_v37 = vor.u32 1.1754944e-38, %v867_v34  ;;  %vm866_vm3 = vcmp.eq.f32.partialorder %v865_v35, 8.507059e+37 }
 0xe36   :  { %v1264_v18 = vpop.eup %1263 }
 0xe37   :  { %v857_v22 = vmul.f32 %v1264_v18, %v855_v16  ;;  %v1266_v26 = vpop.eup %1265  ;;  %vm862_vm15 = vweird.f32 %v1264_v18 }
 0xe38   :  { %v812_v29 = vadd.f32 1.0, %v1266_v26  ;;  %vm863_vm2 = vmor %vm861_vm1, %vm862_vm15 }
 0xe39   :  { %v858_v23 = vsub.f32 1.0, %v857_v22 }
 0xe3a   :  { %1267 = vrcp.f32 %v812_v29  ;;  %v824_v46 = vand.u32 2147483648, %v812_v29  ;;  %vm818_vm5 = vweird.f32 %v812_v29  ;;  %v822_v47 = vand.u32 2147483647, %v812_v29 }
 0xe3b   :  { %v859_v28 = vmul.f32 %v1264_v18, %v858_v23 }
 0xe3c   :  { %v825_v49 = vor.u32 1.1754944e-38, %v824_v46  ;;  %vm823_vm7 = vcmp.eq.f32.partialorder %v822_v47, 8.507059e+37 }
 0xe3d   :  { %v860_v33 = vadd.f32 %v1264_v18, %v859_v28 }
 0xe3f   :  { %v864_v36 = vsel %vm863_vm2, %v1264_v18, %v860_v33 }
 0xe40   :  { %v869_v39 = vsel %vm866_vm3, %v868_v37, %v864_v36  ;;  %v1268_v41 = vpop.eup %1267 }
 0xe41   :  { %v814_v42 = vmul.f32 %v1268_v41, %v812_v29  ;;  %vm819_vm4 = vweird.f32 %v1268_v41 }
 0xe42   :  { %vm820_vm6 = vmor %vm818_vm5, %vm819_vm4 }
 0xe43   :  { %v815_v43 = vsub.f32 1.0, %v814_v42 }
 0xe45   :  { %v816_v44 = vmul.f32 %v1268_v41, %v815_v43 }
 0xe47   :  { %v817_v45 = vadd.f32 %v1268_v41, %v816_v44 }
 0xe49   :  { %v821_v48 = vsel %vm820_vm6, %v1268_v41, %v817_v45 }
 0xe4a   :  { %v826_v51 = vsel %vm823_vm7, %v825_v49, %v821_v48 }
 0xe7f   :  { %v874_v38 = vpop.permute.xlu2 %873 }
 0xe80   :  { %v876_v40 = vmul.f32 %v874_v38, %v869_v39 }
 0xe82   :  { %878 = vrot.lane.b32.xlu1 %v876_v40, %s1405_s9 }
 0xe97   :  { %v831_v50 = vpop.permute.xlu1 %830 }
 0xe98   :  { %v833_v52 = vmul.f32 %v831_v50, %v826_v51 }
 0xe9a   :  { %835 = vrot.lane.b32.xlu0 %v833_v52, %s1405_s9 }
 0xef4   :  { %v879_v53 = vpop.permute.xlu1 %878 }
 0xef5   :  { %v881_v54 = vadd.f32 %v879_v53, %v1562_v30 }
 0xef7   :  { %1269 = vtanh.f32 %v881_v54 }
 0xefd   :  { %v1270_v55 = vpop.eup %1269 }
 0xefe   :  { %v883_v56 = vsub.f32 %v1633_v7, %v1270_v55 }
 0xf00   :  { %885 = vrot.lane.b32.xlu0 %v883_v56, %s1411_s2 }
 0xf0c   :  { %v836_v57 = vpop.permute.xlu0 %835 }
 0xf0d   :  { %v838_v58 = vadd.f32 %v836_v57, %v1559_v24 }
 0xf0f   :  { %1271 = vtanh.f32 %v838_v58 }
 0xf15   :  { %v1272_v59 = vpop.eup %1271 }
 0xf16   :  { %v840_v60 = vsub.f32 %v1631_v6, %v1272_v59 }
 0xf18   :  { %842 = vrot.lane.b32.xlu2 %v840_v60, %s1411_s2 }
 0xf72   :  { %v843_v61 = vpop.permute.xlu2 %842  ;;  %v886_v62 = vpop.permute.xlu0 %885 }
 0xf73   :  { %v845_v63 = vmul.f32 %v843_v61, %v826_v51  ;;  %v888_v0 = vmul.f32 %v886_v62, %v869_v39 }
 0xf75   :  { %847 = vrot.lane.b32.xlu1 %v845_v63, %s1412_s19  ;;  %890 = vrot.lane.b32.xlu2 %v888_v0, %s1412_s19 }
 0xfcf   :  { %v891_v30 = vpop.permute.xlu2 %890 }
 0xfd0   :  { %v1657_v1 = vadd.f32 %v1270_v55, %v891_v30 }
 0xfd2   :  { %899 = vrot.lane.b32.xlu1 %v1657_v1, %s1413_s20 }
 0xfe7   :  { %v848_v24 = vpop.permute.xlu1 %847 }
 0xfe8   :  { %v1661_v2 = vadd.f32 %v1272_v59, %v848_v24  ;;  %v1297_v24 = vld [vmem:[#allocation2 + $0xe] sm:$0x3] }
 0xfea   :  { %895 = vrot.lane.b32.xlu0 %v1661_v2, %s1410_s5 }
0x1044   :  { %v900_v3 = vpop.permute.xlu1 %899 }
0x105c   :  { %v896_v4 = vpop.permute.xlu0 %895 }
0x105d   :  { %v902_v27 = vsel %vm299_vm10, %v896_v4, %v900_v3  ;;  %v1298_v3 = vld [vmem:[#allocation2] sm:$0x3] }
0x105e   :  { %1178 = vmatmul.msk.f32.vlgmr.msrb.gmra.mxu0 %vm112_vm0, %v902_v27 }
0x10db   :  { %v923_v5 = vpop.f32.mrf.mxu0 }
0x10dc   :  { %v946_v6 = vadd.f32 %v923_v5, %v1490_v21  ;;  %v989_v7 = vadd.f32 %v923_v5, %v1497_v25  ;;  %v926_v19 = vadd.f32 %v923_v5, %v1531_v32  ;;  %v969_v11 = vadd.f32 %v923_v5, %v1529_v31 }
0x10de   :  { %991 = vrot.lane.b32.xlu0 %v989_v7, %s1410_s5  ;;  %948 = vrot.lane.b32.xlu2 %v946_v6, %s1410_s5  ;;  %v1179_v8 = vmul.f32 -1.442695, %v926_v19  ;;  %v1180_v13 = vmul.f32 -1.442695, %v969_v11 }
0x10e0   :  { %1273 = vpow2.f32 %v1179_v8 }
0x10e6   :  { %v1274_v9 = vpop.eup %1273 }
0x10e7   :  { %v930_v10 = vadd.f32 1.0, %v1274_v9 }
0x10e9   :  { %1275 = vrcp.f32 %v930_v10  ;;  %v942_v22 = vand.u32 2147483648, %v930_v10  ;;  %vm936_vm9 = vweird.f32 %v930_v10  ;;  %v940_v23 = vand.u32 2147483647, %v930_v10 }
0x10ea   :  { %1277 = vpow2.f32 %v1180_v13 }
0x10eb   :  { %v943_v28 = vor.u32 1.1754944e-38, %v942_v22  ;;  %vm941_vm12 = vcmp.eq.f32.partialorder %v940_v23, 8.507059e+37 }
0x10ef   :  { %v1276_v12 = vpop.eup %1275 }
0x10f0   :  { %v932_v14 = vmul.f32 %v1276_v12, %v930_v10  ;;  %v1278_v16 = vpop.eup %1277  ;;  %vm937_vm8 = vweird.f32 %v1276_v12 }
0x10f1   :  { %v973_v18 = vadd.f32 1.0, %v1278_v16  ;;  %vm938_vm11 = vmor %vm936_vm9, %vm937_vm8  ;;  %vm1139_vm9 = vcmask 254976  }
0x10f2   :  { %v933_v15 = vsub.f32 1.0, %v932_v14 }
0x10f3   :  { %1279 = vrcp.f32 %v973_v18  ;;  %v985_v40 = vand.u32 2147483648, %v973_v18  ;;  %vm979_vm14 = vweird.f32 %v973_v18  ;;  %v983_v41 = vand.u32 2147483647, %v973_v18 }
0x10f4   :  { %v934_v17 = vmul.f32 %v1276_v12, %v933_v15 }
0x10f5   :  { %v986_v43 = vor.u32 1.1754944e-38, %v985_v40  ;;  %vm984_vm1 = vcmp.eq.f32.partialorder %v983_v41, 8.507059e+37 }
0x10f6   :  { %v935_v20 = vadd.f32 %v1276_v12, %v934_v17 }
0x10f8   :  { %v939_v26 = vsel %vm938_vm11, %v1276_v12, %v935_v20 }
0x10f9   :  { %v944_v33 = vsel %vm941_vm12, %v943_v28, %v939_v26  ;;  %v1280_v35 = vpop.eup %1279 }
0x10fa   :  { %v975_v36 = vmul.f32 %v1280_v35, %v973_v18  ;;  %vm980_vm13 = vweird.f32 %v1280_v35 }
0x10fb   :  { %vm981_vm15 = vmor %vm979_vm14, %vm980_vm13 }
0x10fc   :  { %v976_v37 = vsub.f32 1.0, %v975_v36 }
0x10fe   :  { %v977_v38 = vmul.f32 %v1280_v35, %v976_v37 }
0x1100   :  { %v978_v39 = vadd.f32 %v1280_v35, %v977_v38 }
0x1102   :  { %v982_v42 = vsel %vm981_vm15, %v1280_v35, %v978_v39 }
0x1103   :  { %v987_v45 = vsel %vm984_vm1, %v986_v43, %v982_v42 }
0x1138   :  { %v949_v29 = vpop.permute.xlu2 %948 }
0x1139   :  { %v951_v34 = vmul.f32 %v949_v29, %v944_v33 }
0x113b   :  { %953 = vrot.lane.b32.xlu1 %v951_v34, %s1405_s9 }
0x1150   :  { %v992_v44 = vpop.permute.xlu0 %991 }
0x1151   :  { %v994_v46 = vmul.f32 %v992_v44, %v987_v45 }
0x1153   :  { %996 = vrot.lane.b32.xlu2 %v994_v46, %s1405_s9 }
0x11ad   :  { %v997_v47 = vpop.permute.xlu2 %996  ;;  %v954_v48 = vpop.permute.xlu1 %953 }
0x11ae   :  { %v999_v49 = vadd.f32 %v997_v47, %v1529_v31  ;;  %v956_v50 = vadd.f32 %v954_v48, %v1531_v32 }
0x11b0   :  { %1281 = vtanh.f32 %v999_v49 }
0x11b1   :  { %1283 = vtanh.f32 %v956_v50 }
0x11b6   :  { %v1282_v51 = vpop.eup %1281 }
0x11b7   :  { %v1284_v52 = vpop.eup %1283  ;;  %v1001_v53 = vsub.f32 %v1657_v1, %v1282_v51 }
0x11b8   :  { %v958_v54 = vsub.f32 %v1661_v2, %v1284_v52 }
0x11b9   :  { %1003 = vrot.lane.b32.xlu1 %v1001_v53, %s1411_s2 }
0x11ba   :  { %960 = vrot.lane.b32.xlu0 %v958_v54, %s1411_s2 }
0x122b   :  { %v1004_v55 = vpop.permute.xlu1 %1003 }
0x122c   :  { %v961_v56 = vpop.permute.xlu0 %960  ;;  %v1006_v57 = vmul.f32 %v1004_v55, %v987_v45 }
0x122d   :  { %v963_v58 = vmul.f32 %v961_v56, %v944_v33 }
0x122e   :  { %1008 = vrot.lane.b32.xlu0 %v1006_v57, %s1412_s19 }
0x122f   :  { %965 = vrot.lane.b32.xlu2 %v963_v58, %s1412_s19 }
0x1289   :  { %v966_v31 = vpop.permute.xlu2 %965 }
0x128a   :  { %v1683_v32 = vadd.f32 %v1284_v52, %v966_v31 }
0x128c   :  { %1013 = vrot.lane.b32.xlu1 %v1683_v32, %s1410_s5 }
0x12a0   :  { %v1009_v59 = vpop.permute.xlu0 %1008 }
0x12a1   :  { %v1687_v60 = vadd.f32 %v1282_v51, %v1009_v59 }
0x12a3   :  { %1017 = vrot.lane.b32.xlu2 %v1687_v60, %s1413_s20 }
0x12fd   :  { %v1018_v61 = vpop.permute.xlu2 %1017 }
0x12fe   :  { %v1014_v62 = vpop.permute.xlu1 %1013 }
0x12ff   :  { %v1020_v63 = vsel %vm299_vm10, %v1014_v62, %v1018_v61 }
0x1300   :  { %1181 = vmatmul.msk.f32.vlgmr.msra.gmra.mxu1 %vm112_vm0, %v1020_v63 }
0x137d   :  { %v1041_v0 = vpop.f32.mrf.mxu1 }
0x137e   :  { %v1064_v30 = vadd.f32 %v1041_v0, %v1490_v21  ;;  %v1107_v1 = vadd.f32 %v1041_v0, %v1497_v25  ;;  %v1044_v2 = vadd.f32 %v1297_v24, %v1041_v0  ;;  %v1087_v4 = vadd.f32 %v1298_v3, %v1041_v0 }
0x1380   :  { %1109 = vrot.lane.b32.xlu1 %v1107_v1, %s1410_s5  ;;  %1066 = vrot.lane.b32.xlu0 %v1064_v30, %s1410_s5  ;;  %v1182_v27 = vmul.f32 -1.442695, %v1044_v2  ;;  %v1183_v5 = vmul.f32 -1.442695, %v1087_v4 }
0x1382   :  { %1285 = vpow2.f32 %v1182_v27 }
0x1383   :  { %1287 = vpow2.f32 %v1183_v5 }
0x1388   :  { %v1286_v6 = vpop.eup %1285 }
0x1389   :  { %v1288_v7 = vpop.eup %1287  ;;  %v1048_v19 = vadd.f32 1.0, %v1286_v6 }
0x138a   :  { %v1091_v8 = vadd.f32 1.0, %v1288_v7 }
0x138b   :  { %1289 = vrcp.f32 %v1048_v19  ;;  %vm1054_vm3 = vweird.f32 %v1048_v19  ;;  %v1060_v18 = vand.u32 2147483648, %v1048_v19  ;;  %v1058_v22 = vand.u32 2147483647, %v1048_v19 }
0x138c   :  { %1291 = vrcp.f32 %v1091_v8  ;;  %v1103_v17 = vand.u32 2147483648, %v1091_v8  ;;  %vm1097_vm4 = vweird.f32 %v1091_v8  ;;  %v1101_v20 = vand.u32 2147483647, %v1091_v8 }
0x138d   :  { %v1061_v29 = vor.u32 1.1754944e-38, %v1060_v18  ;;  %vm1059_vm8 = vcmp.eq.f32.partialorder %v1058_v22, 8.507059e+37 }
0x138e   :  { %v1104_v28 = vor.u32 1.1754944e-38, %v1103_v17  ;;  %vm1102_vm7 = vcmp.eq.f32.partialorder %v1101_v20, 8.507059e+37 }
0x1391   :  { %v1290_v21 = vpop.eup %1289 }
0x1392   :  { %v1292_v25 = vpop.eup %1291  ;;  %v1050_v10 = vmul.f32 %v1290_v21, %v1048_v19  ;;  %vm1055_vm0 = vweird.f32 %v1290_v21 }
0x1393   :  { %v1093_v9 = vmul.f32 %v1292_v25, %v1091_v8  ;;  %vm1098_vm2 = vweird.f32 %v1292_v25  ;;  %vm1056_vm5 = vmor %vm1054_vm3, %vm1055_vm0 }
0x1394   :  { %v1051_v12 = vsub.f32 1.0, %v1050_v10  ;;  %vm1099_vm6 = vmor %vm1097_vm4, %vm1098_vm2 }
0x1395   :  { %v1094_v11 = vsub.f32 1.0, %v1093_v9 }
0x1396   :  { %v1052_v14 = vmul.f32 %v1290_v21, %v1051_v12 }
0x1397   :  { %v1095_v13 = vmul.f32 %v1292_v25, %v1094_v11 }
0x1398   :  { %v1053_v16 = vadd.f32 %v1290_v21, %v1052_v14 }
0x1399   :  { %v1096_v15 = vadd.f32 %v1292_v25, %v1095_v13 }
0x139a   :  { %v1057_v26 = vsel %vm1056_vm5, %v1290_v21, %v1053_v16 }
0x139b   :  { %v1100_v23 = vsel %vm1099_vm6, %v1292_v25, %v1096_v15  ;;  %v1062_v36 = vsel %vm1059_vm8, %v1061_v29, %v1057_v26 }
0x139c   :  { %v1105_v34 = vsel %vm1102_vm7, %v1104_v28, %v1100_v23 }
0x13f2   :  { %v1110_v33 = vpop.permute.xlu1 %1109  ;;  %v1067_v35 = vpop.permute.xlu0 %1066 }
0x13f3   :  { %v1112_v37 = vmul.f32 %v1110_v33, %v1105_v34  ;;  %v1069_v38 = vmul.f32 %v1067_v35, %v1062_v36 }
0x13f5   :  { %1114 = vrot.lane.b32.xlu0 %v1112_v37, %s1405_s9  ;;  %1071 = vrot.lane.b32.xlu2 %v1069_v38, %s1405_s9 }
0x144f   :  { %v1072_v39 = vpop.permute.xlu2 %1071 }
0x1450   :  { %v1074_v40 = vadd.f32 %v1297_v24, %v1072_v39 }
0x1452   :  { %1293 = vtanh.f32 %v1074_v40 }
0x1458   :  { %v1294_v41 = vpop.eup %1293 }
0x1459   :  { %v1076_v42 = vsub.f32 %v1683_v32, %v1294_v41 }
0x145b   :  { %1078 = vrot.lane.b32.xlu1 %v1076_v42, %s1411_s2 }
0x1467   :  { %v1115_v43 = vpop.permute.xlu0 %1114 }
0x1468   :  { %v1117_v44 = vadd.f32 %v1298_v3, %v1115_v43 }
0x146a   :  { %1295 = vtanh.f32 %v1117_v44 }
0x1470   :  { %v1296_v45 = vpop.eup %1295 }
0x1471   :  { %v1119_v46 = vsub.f32 %v1687_v60, %v1296_v45 }
0x1473   :  { %1121 = vrot.lane.b32.xlu2 %v1119_v46, %s1411_s2 }
0x14cd   :  { %v1079_v47 = vpop.permute.xlu1 %1078  ;;  %v1122_v48 = vpop.permute.xlu2 %1121 }
0x14ce   :  { %v1081_v49 = vmul.f32 %v1079_v47, %v1062_v36  ;;  %v1124_v50 = vmul.f32 %v1122_v48, %v1105_v34 }
0x14d0   :  { %1083 = vrot.lane.b32.xlu0 %v1081_v49, %s1412_s19  ;;  %1126 = vrot.lane.b32.xlu1 %v1124_v50, %s1412_s19 }
0x1542   :  { %v1084_v51 = vpop.permute.xlu0 %1083  ;;  %v1127_v52 = vpop.permute.xlu1 %1126 }
0x1543   :  { %v1086_v53 = vadd.f32 %v1294_v41, %v1084_v51  ;;  %v1129_v54 = vadd.f32 %v1296_v45, %v1127_v52 }
0x1545   :  { %1131 = vrot.lane.b32.xlu2 %v1086_v53, %s1410_s5  ;;  %1135 = vrot.lane.b32.xlu0 %v1129_v54, %s1413_s20 }
0x159f   :  { %v1132_v55 = vpop.permute.xlu2 %1131 }
0x15b7   :  { %v1136_v56 = vpop.permute.xlu0 %1135 }
0x15b8   :  { %v1138_v57 = vsel %vm299_vm10, %v1132_v55, %v1136_v56 }
0x15b9   :  { %1140 = vst.msk [vmem:[#allocation9] sm:$0x3] %vm1139_vm9, %v1138_v57 }
0x15ba   :  { %1151 = dma.vmem_to_hbm [thread:$0]  %s1147_s22, 32, %s1149_s25, [#allocation5]  }
0x15bb   :  { %1399 = dma.done.wait [#allocation5], 32  }
0x15bc   :  { %1400 = vsyncadd [#allocation5], 4294967264 }
0x15bd   :  { %1156 = vsyncpa [#allocation4], 1 }
0x15be   :  { %1157 = vsyncpa [#allocation7], 1 }
0x15bf   :  { %1158 = vsyncpa [#allocation5], 1 }

</bundles_post_ra>
